<compile_context>
chip_gen: v6e
topology: v6e:2x2x1
jax: 0.10.0
libtpu: 0.0.40
codegen_flags: <defaults>
</compile_context>

<pallas_src>
import numpy as np
import jax
import jax.numpy as jnp
from jax.experimental import pallas as pl
from jax.experimental.pallas import tpu as pltpu

# ----- Model hyperparameters (mirror the PyTorch module) -----
INPUT_C, INPUT_H, INPUT_W = 4, 16, 16
CONV_FILTERS = 2
CONV_KERNEL_SIZE = 2
CONV_STRIDES = 1
LINEAR_OUTPUT_FEATURES = 1
CONV_OUT_H = (INPUT_H - CONV_KERNEL_SIZE) // CONV_STRIDES + 1   # 15
CONV_OUT_W = (INPUT_W - CONV_KERNEL_SIZE) // CONV_STRIDES + 1   # 15
OHW = CONV_OUT_H * CONV_OUT_W                                   # 225
FLATTENED = OHW * CONV_FILTERS                                  # 450

HW = INPUT_H * INPUT_W                                          # 256
CHW = INPUT_C * HW                                              # 1024
FLAT_PAD = ((FLATTENED + 127) // 128) * 128                     # 512 (lane-aligned)

# Static scatter indices for expanding the conv into a (CHW, FLAT_PAD) matrix.
# Row r = c*HW + ih*W + iw (flat NCHW input index), column j = f*OH*OW + oh*OW + ow
# (PyTorch's flatten order of the conv output).  Each (r, j) pair is unique.
_f, _c, _kh, _kw, _oh, _ow = np.meshgrid(
    np.arange(CONV_FILTERS), np.arange(INPUT_C),
    np.arange(CONV_KERNEL_SIZE), np.arange(CONV_KERNEL_SIZE),
    np.arange(CONV_OUT_H), np.arange(CONV_OUT_W), indexing="ij")
_ROWS = (_c * HW + (_oh * CONV_STRIDES + _kh) * INPUT_W
         + (_ow * CONV_STRIDES + _kw)).reshape(-1)
_COLS = (_f * OHW + _oh * CONV_OUT_W + _ow).reshape(-1)
_FI, _CI, _KHI, _KWI = (a.reshape(-1) for a in (_f, _c, _kh, _kw))


def simple_cnn_kernel(x_ref, wexp_ref, params_ref, bl_ref, o_ref):
    """One batch tile of the whole forward pass.

    x_ref     : (TB, CHW)       f32 VMEM  channel-major flatten of NCHW input (free reshape)
    wexp_ref  : (CHW, FLAT_PAD) f32 VMEM  conv expanded to a dense matrix (resident)
    params_ref: (8, FLAT_PAD)   f32 VMEM  row 0 = per-column conv bias, row 1 = linear weight
    bl_ref    : (1,)            f32 SMEM  linear bias
    o_ref     : (1, TB)         f32 VMEM  sigmoid(logits), batch on lanes
    """
    tb = o_ref.shape[1]

    # Conv as a single MXU matmul; column j of z is conv output (f, oh, ow) in PyTorch
    # flatten order (padding columns are exact zeros).
    z = jnp.dot(x_ref[...], wexp_ref[...], preferred_element_type=jnp.float32)  # (TB, FLAT_PAD)

    # Conv bias + ReLU (padding columns stay 0), then the linear layer as an elementwise
    # product with the padded linear weight followed by one lane reduction per batch row.
    z = jnp.maximum(z + params_ref[0:1, :], 0.0)
    logits = jnp.sum(z * params_ref[1:2, :], axis=1) + bl_ref[0]                 # (TB,)

    o_ref[...] = (1.0 / (1.0 + jnp.exp(-logits))).reshape(1, tb).astype(o_ref.dtype)


def _round_up(v, m):
    return ((v + m - 1) // m) * m


@jax.jit
def simple_cnn_forward(x_nchw, conv_w, conv_b, lin_w, lin_b):
    """PyTorch-layout params/inputs -> lane-dense kernel layouts -> pallas_call."""
    B = x_nchw.shape[0]

    # --- Batch tiling: big, aligned, unmasked tiles; >=2 grid steps for large batches ---
    B8 = _round_up(B, 8)
    if B8 <= 512:
        TB = B8                                             # one step; out block == full output
    else:
        # >= 2 steps of 128-aligned rows: shards the "parallel" axis across v7x's two TCs;
        # a 1024-row x tile is 4 MiB (8 MiB double-buffered) — safe on every generation.
        TB = min(_round_up(pl.cdiv(B8, 2), 128), 1024)
    B_pad = _round_up(B8, TB)
    nb = B_pad // TB

    # --- Input: free reshape (no transpose), zero-pad batch so every DMA is full-width ---
    x_flat = x_nchw.reshape(B, CHW).astype(jnp.float32)
    x_flat = jnp.pad(x_flat, ((0, B_pad - B), (0, 0)))

    # --- Expand the conv into a (CHW, FLAT_PAD) matrix (done once per call, tiny) ---
    vals = conv_w.astype(jnp.float32)[_FI, _CI, _KHI, _KWI]
    w_exp = jnp.zeros((CHW, FLAT_PAD), jnp.float32).at[jnp.asarray(_ROWS),
                                                       jnp.asarray(_COLS)].add(vals)

    # --- Per-column conv bias + padded linear weight in one aligned (8, FLAT_PAD) tile ---
    bias_col = jnp.pad(jnp.repeat(conv_b.astype(jnp.float32), OHW),
                       (0, FLAT_PAD - FLATTENED))
    wl_col = jnp.pad(lin_w.reshape(-1).astype(jnp.float32), (0, FLAT_PAD - FLATTENED))
    params = jnp.zeros((8, FLAT_PAD), jnp.float32).at[0].set(bias_col).at[1].set(wl_col)

    bl = lin_b.reshape(LINEAR_OUTPUT_FEATURES).astype(jnp.float32)

    out = pl.pallas_call(
        simple_cnn_kernel,
        out_shape=jax.ShapeDtypeStruct((1, B_pad), jnp.float32),
        grid=(nb,),
        in_specs=[
            pl.BlockSpec((TB, CHW), lambda i: (i, 0)),            # x: tiled over batch
            pl.BlockSpec((CHW, FLAT_PAD), lambda i: (0, 0)),      # expanded conv: resident
            pl.BlockSpec((8, FLAT_PAD), lambda i: (0, 0)),        # bias/linear weight: resident
            pl.BlockSpec(memory_space=pltpu.MemorySpace.SMEM),    # linear bias scalar
        ],
        out_specs=pl.BlockSpec((1, TB), lambda i: (0, i)),
        compiler_params=pltpu.CompilerParams(
            dimension_semantics=("parallel",),
            vmem_limit_bytes=32 * 1024 * 1024,
        ),
    )(x_flat, w_exp, params, bl)

    return out[0, :B].reshape(B, LINEAR_OUTPUT_FEATURES)


def reference_forward(x_nchw, conv_w, conv_b, lin_w, lin_b):
    """Pure-JAX reference matching PyTorch semantics (NCHW conv, CHW flatten)."""
    y = jax.lax.conv_general_dilated(
        x_nchw, conv_w, window_strides=(CONV_STRIDES, CONV_STRIDES),
        padding='VALID', dimension_numbers=('NCHW', 'OIHW', 'NCHW'))
    y = y + conv_b[None, :, None, None]
    y = jnp.maximum(y, 0.0)
    y = y.reshape(y.shape[0], -1)
    y = y @ lin_w.T + lin_b
    return jax.nn.sigmoid(y)


if __name__ == "__main__":
    key = jax.random.PRNGKey(0)
    k1, k2, k3, k4, k5 = jax.random.split(key, 5)

    B = 2
    x = jax.random.normal(k1, (B, INPUT_C, INPUT_H, INPUT_W), jnp.float32)
    conv_w = 0.1 * jax.random.normal(
        k2, (CONV_FILTERS, INPUT_C, CONV_KERNEL_SIZE, CONV_KERNEL_SIZE), jnp.float32)
    conv_b = 0.1 * jax.random.normal(k3, (CONV_FILTERS,), jnp.float32)
    lin_w = 0.05 * jax.random.normal(k4, (LINEAR_OUTPUT_FEATURES, FLATTENED), jnp.float32)
    lin_b = 0.1 * jax.random.normal(k5, (LINEAR_OUTPUT_FEATURES,), jnp.float32)

    out = simple_cnn_forward(x, conv_w, conv_b, lin_w, lin_b)
    out = jax.block_until_ready(out)

    ref = reference_forward(x, conv_w, conv_b, lin_w, lin_b)
    assert out.shape == (B, LINEAR_OUTPUT_FEATURES), out.shape
    assert jnp.allclose(out, ref, atol=1e-5, rtol=1e-5), (out, ref)

    print("KERNEL_OK")
</pallas_src>

<mosaic_0001>
module attributes {stable_mosaic.version = 11 : i64} {
  func.func private @main(%arg0: i32) attributes {dimension_semantics = [#tpu.dimension_semantics<core_parallel>], iteration_bounds = array<i64: 2>, tpu.core_type = #tpu.core_type<sc_scalar_subcore>, window_params = []} {
    return
  }
}

module attributes {stable_mosaic.version = 11 : i64} {
  func.func private @main(%arg0: i32) attributes {dimension_semantics = [#tpu.dimension_semantics<core_parallel>], iteration_bounds = array<i64: 2>, tpu.core_type = #tpu.core_type<sc_scalar_subcore>, window_params = []} {
    return
  }
}

module attributes {stable_mosaic.version = 11 : i64} {
  func.func @simple_cnn_kernel(%arg0: i32, %arg1: memref<8x1024xf32, #tpu.memory_space<vmem>>, %arg2: memref<1024x512xf32, #tpu.memory_space<vmem>>, %arg3: memref<8x512xf32, #tpu.memory_space<vmem>>, %arg4: memref<1xf32, #tpu.memory_space<smem>>, %arg5: memref<1x8xf32, #tpu.memory_space<vmem>>) attributes {dimension_semantics = [#tpu.dimension_semantics<parallel>], iteration_bounds = array<i64: 1>, scalar_prefetch = 0 : i64, scratch_operands = 0 : i64, tpu.core_type = #tpu.core_type<tc>, window_params = [{transform_indices = @transform_0, window_bounds = array<i64: 8, 1024>}, {pipeline_mode = #tpu.pipeline_mode<synchronous>, transform_indices = @transform_1, window_bounds = array<i64: 1024, 512>}, {pipeline_mode = #tpu.pipeline_mode<synchronous>, transform_indices = @transform_2, window_bounds = array<i64: 8, 512>}, {transform_indices = @transform_3, window_bounds = array<i64: 1>}, {transform_indices = @transform_4, window_bounds = array<i64: 1, 8>}]} {
    %c0 = arith.constant 0 : index
    %c0_0 = arith.constant 0 : index
    %0 = vector.load %arg1[%c0, %c0_0] : memref<8x1024xf32, #tpu.memory_space<vmem>>, vector<8x1024xf32>
    %c0_1 = arith.constant 0 : index
    %c0_2 = arith.constant 0 : index
    %1 = vector.load %arg2[%c0_1, %c0_2] : memref<1024x512xf32, #tpu.memory_space<vmem>>, vector<1024x512xf32>
    %cst = arith.constant dense<0.000000e+00> : vector<8x512xf32>
    %2 = tpu.matmul %0, %1, %cst {dimension_numbers = #tpu.dot_dimension_numbers<[1], [0], [0], [1], [0, 0, 1, 1], [], []>} : vector<8x1024xf32>, vector<1024x512xf32>, vector<8x512xf32> -> vector<8x512xf32>
    %c0_3 = arith.constant 0 : index
    %c0_4 = arith.constant 0 : index
    %3 = vector.load %arg3[%c0_3, %c0_4] : memref<8x512xf32, #tpu.memory_space<vmem>>, vector<1x512xf32>
    %4 = vector.broadcast %3 : vector<1x512xf32> to vector<8x512xf32>
    %5 = arith.addf %2, %4 : vector<8x512xf32>
    %cst_5 = arith.constant 0.000000e+00 : f32
    %6 = vector.broadcast %cst_5 : f32 to vector<8x512xf32>
    %7 = arith.maximumf %5, %6 : vector<8x512xf32>
    %c1 = arith.constant 1 : index
    %c0_6 = arith.constant 0 : index
    %8 = vector.load %arg3[%c1, %c0_6] : memref<8x512xf32, #tpu.memory_space<vmem>>, vector<1x512xf32>
    %9 = vector.broadcast %8 : vector<1x512xf32> to vector<8x512xf32>
    %10 = arith.mulf %7, %9 : vector<8x512xf32>
    %cst_7 = arith.constant dense<0.000000e+00> : vector<8xf32>
    %11 = vector.multi_reduction <add>, %10, %cst_7 [1] : vector<8x512xf32> to vector<8xf32>
    %c0_8 = arith.constant 0 : index
    %12 = memref.load %arg4[%c0_8] : memref<1xf32, #tpu.memory_space<smem>>
    %13 = vector.broadcast %12 : f32 to vector<8xf32>
    %14 = arith.addf %11, %13 : vector<8xf32>
    %cst_9 = arith.constant 0.000000e+00 : f32
    %15 = vector.broadcast %cst_9 : f32 to vector<8xf32>
    %16 = arith.subf %15, %14 : vector<8xf32>
    %17 = math.exp %16 : vector<8xf32>
    %cst_10 = arith.constant 1.000000e+00 : f32
    %18 = vector.broadcast %cst_10 : f32 to vector<8xf32>
    %19 = arith.addf %18, %17 : vector<8xf32>
    %cst_11 = arith.constant 1.000000e+00 : f32
    %20 = vector.broadcast %cst_11 : f32 to vector<8xf32>
    %21 = arith.divf %20, %19 : vector<8xf32>
    %22 = vector.shape_cast %21 : vector<8xf32> to vector<1x8xf32>
    %c0_12 = arith.constant 0 : index
    %c0_13 = arith.constant 0 : index
    %23 = vector.load %arg5[%c0_12, %c0_13] : memref<1x8xf32, #tpu.memory_space<vmem>>, vector<1x8xf32>
    tpu.vector_store %arg5[%c0_12, %c0_13], %22 {strides = array<i32>} : memref<1x8xf32, #tpu.memory_space<vmem>>, vector<1x8xf32>,
    return
  }
  func.func @transform_0(%arg0: i32) -> (i32, i32) {
    %c0_i32 = arith.constant 0 : i32
    %c0_i32_0 = arith.constant 0 : i32
    return %arg0, %c0_i32 : i32, i32
  }
  func.func @transform_1(%arg0: i32) -> (i32, i32) {
    %c0_i32 = arith.constant 0 : i32
    %c0_i32_0 = arith.constant 0 : i32
    %c0_i32_1 = arith.constant 0 : i32
    return %c0_i32, %c0_i32_0 : i32, i32
  }
  func.func @transform_2(%arg0: i32) -> (i32, i32) {
    %c0_i32 = arith.constant 0 : i32
    %c0_i32_0 = arith.constant 0 : i32
    %c0_i32_1 = arith.constant 0 : i32
    return %c0_i32, %c0_i32_0 : i32, i32
  }
  func.func @transform_3(%arg0: i32) -> i32 {
    %c0_i32 = arith.constant 0 : i32
    %c0_i32_0 = arith.constant 0 : i32
    return %c0_i32 : i32
  }
  func.func @transform_4(%arg0: i32) -> (i32, i32) {
    %c0_i32 = arith.constant 0 : i32
    %c0_i32_0 = arith.constant 0 : i32
    return %c0_i32, %arg0 : i32, i32
  }
}

</mosaic_0001>

<bundles_post_ra>
// kernel: simple_cnn_forward.1
= control target key start
LH: loop header
LB: loop body
LE: loop exit
PB: predicated region body
PF: predicated region fallthrough
CT: control target
= control target key end

     0   :  { %vm1181_vm0 = vcmask 57344   ;;  %s2830_s1 = inlined_call_operand.vmem [shape: f32[1024,512], index: 1, kind: input, shape index: {}]   ;;  %s2831_s0 = inlined_call_operand.vmem [shape: f32[8,1024], index: 0, kind: input, shape index: {}]   ;;  %s2832_s2 = inlined_call_operand.vmem [shape: f32[8,512], index: 2, kind: input, shape index: {}]   ;;  %s2833_s3 = inlined_call_operand.<no memory space> [shape: f32[1], index: 3, kind: input, shape index: {}]   ;;  %s2834_s4 = inlined_call_operand.vmem [shape: f32[1,8], index: 4, kind: output, shape index: {}]  }
   0x1   :  { %v87_v0 = vld [vmem:[%s2830_s1 + $0x1e8] sm:$0xff]  ;;  %v86_v2 = vld [vmem:[%s2830_s1 + $0x1e0] sm:$0xff] }
   0x2   :  { %v215_v1 = vld [vmem:[%s2830_s1 + $0x5e8] sm:$0xff]  ;;  %560 = vmatprep.subr.mxu0 %v87_v0  ;;  %v214_v3 = vld [vmem:[%s2830_s1 + $0x5e0] sm:$0xff] }
   0x3   :  { %631 = vmatprep.subr.mxu1 %v215_v1  ;;  %v83_v4 = vld [vmem:[%s2830_s1 + $0x1c8] sm:$0xff]  ;;  %561 = vmatpush1.msra.mxu0 %v86_v2  ;;  %v82_v6 = vld [vmem:[%s2830_s1 + $0x1c0] sm:$0xff] }
   0x4   :  { %v211_v5 = vld [vmem:[%s2830_s1 + $0x5c8] sm:$0xff]  ;;  %632 = vmatpush1.msra.mxu1 %v214_v3  ;;  %v210_v7 = vld [vmem:[%s2830_s1 + $0x5c0] sm:$0xff]  ;;  %562 = vmatprep.subr.mxu0 %v83_v4 }
   0x5   :  { %v79_v8 = vld [vmem:[%s2830_s1 + $0x1a8] sm:$0xff]  ;;  %633 = vmatprep.subr.mxu1 %v211_v5  ;;  %v78_v10 = vld [vmem:[%s2830_s1 + $0x1a0] sm:$0xff]  ;;  %563 = vmatpush1.msra.mxu0 %v82_v6 }
   0x6   :  { %v207_v9 = vld [vmem:[%s2830_s1 + $0x5a8] sm:$0xff]  ;;  %v206_v11 = vld [vmem:[%s2830_s1 + $0x5a0] sm:$0xff]  ;;  %634 = vmatpush1.msra.mxu1 %v210_v7  ;;  %564 = vmatprep.subr.mxu0 %v79_v8 }
   0x7   :  { %v75_v12 = vld [vmem:[%s2830_s1 + $0x188] sm:$0xff]  ;;  %635 = vmatprep.subr.mxu1 %v207_v9  ;;  %v74_v14 = vld [vmem:[%s2830_s1 + $0x180] sm:$0xff]  ;;  %565 = vmatpush1.msra.mxu0 %v78_v10 }
   0x8   :  { %v203_v13 = vld [vmem:[%s2830_s1 + $0x588] sm:$0xff]  ;;  %v202_v15 = vld [vmem:[%s2830_s1 + $0x580] sm:$0xff]  ;;  %636 = vmatpush1.msra.mxu1 %v206_v11  ;;  %566 = vmatprep.subr.mxu0 %v75_v12 }
   0x9   :  { %v71_v16 = vld [vmem:[%s2830_s1 + $0x168] sm:$0xff]  ;;  %637 = vmatprep.subr.mxu1 %v203_v13  ;;  %v70_v18 = vld [vmem:[%s2830_s1 + $0x160] sm:$0xff]  ;;  %567 = vmatpush1.msra.mxu0 %v74_v14 }
   0xa   :  { %v199_v17 = vld [vmem:[%s2830_s1 + $0x568] sm:$0xff]  ;;  %v198_v19 = vld [vmem:[%s2830_s1 + $0x560] sm:$0xff]  ;;  %638 = vmatpush1.msra.mxu1 %v202_v15  ;;  %568 = vmatprep.subr.mxu0 %v71_v16 }
   0xb   :  { %v67_v20 = vld [vmem:[%s2830_s1 + $0x148] sm:$0xff]  ;;  %639 = vmatprep.subr.mxu1 %v199_v17  ;;  %v66_v22 = vld [vmem:[%s2830_s1 + $0x140] sm:$0xff]  ;;  %569 = vmatpush1.msra.mxu0 %v70_v18 }
   0xc   :  { %v195_v21 = vld [vmem:[%s2830_s1 + $0x548] sm:$0xff]  ;;  %v194_v23 = vld [vmem:[%s2830_s1 + $0x540] sm:$0xff]  ;;  %640 = vmatpush1.msra.mxu1 %v198_v19  ;;  %570 = vmatprep.subr.mxu0 %v67_v20 }
   0xd   :  { %v63_v24 = vld [vmem:[%s2830_s1 + $0x128] sm:$0xff]  ;;  %641 = vmatprep.subr.mxu1 %v195_v21  ;;  %v62_v26 = vld [vmem:[%s2830_s1 + $0x120] sm:$0xff]  ;;  %571 = vmatpush1.msra.mxu0 %v66_v22 }
   0xe   :  { %v191_v25 = vld [vmem:[%s2830_s1 + $0x528] sm:$0xff]  ;;  %v190_v27 = vld [vmem:[%s2830_s1 + $0x520] sm:$0xff]  ;;  %642 = vmatpush1.msra.mxu1 %v194_v23  ;;  %572 = vmatprep.subr.mxu0 %v63_v24 }
   0xf   :  { %v59_v28 = vld [vmem:[%s2830_s1 + $0x108] sm:$0xff]  ;;  %643 = vmatprep.subr.mxu1 %v191_v25  ;;  %v58_v30 = vld [vmem:[%s2830_s1 + $0x100] sm:$0xff]  ;;  %573 = vmatpush1.msra.mxu0 %v62_v26 }
  0x10   :  { %v187_v29 = vld [vmem:[%s2830_s1 + $0x508] sm:$0xff]  ;;  %v186_v31 = vld [vmem:[%s2830_s1 + $0x500] sm:$0xff]  ;;  %644 = vmatpush1.msra.mxu1 %v190_v27  ;;  %574 = vmatprep.subr.mxu0 %v59_v28 }
  0x11   :  { %v55_v32 = vld [vmem:[%s2830_s1 + $0xe8] sm:$0xff]  ;;  %645 = vmatprep.subr.mxu1 %v187_v29  ;;  %v54_v34 = vld [vmem:[%s2830_s1 + $0xe0] sm:$0xff]  ;;  %575 = vmatpush1.msra.mxu0 %v58_v30 }
  0x12   :  { %v183_v33 = vld [vmem:[%s2830_s1 + $0x4e8] sm:$0xff]  ;;  %v182_v35 = vld [vmem:[%s2830_s1 + $0x4e0] sm:$0xff]  ;;  %646 = vmatpush1.msra.mxu1 %v186_v31  ;;  %576 = vmatprep.subr.mxu0 %v55_v32 }
  0x13   :  { %v51_v36 = vld [vmem:[%s2830_s1 + $0xc8] sm:$0xff]  ;;  %647 = vmatprep.subr.mxu1 %v183_v33  ;;  %v50_v38 = vld [vmem:[%s2830_s1 + $0xc0] sm:$0xff]  ;;  %577 = vmatpush1.msra.mxu0 %v54_v34 }
  0x14   :  { %v179_v37 = vld [vmem:[%s2830_s1 + $0x4c8] sm:$0xff]  ;;  %v178_v39 = vld [vmem:[%s2830_s1 + $0x4c0] sm:$0xff]  ;;  %648 = vmatpush1.msra.mxu1 %v182_v35  ;;  %578 = vmatprep.subr.mxu0 %v51_v36 }
  0x15   :  { %v47_v40 = vld [vmem:[%s2830_s1 + $0xa8] sm:$0xff]  ;;  %649 = vmatprep.subr.mxu1 %v179_v37  ;;  %v46_v42 = vld [vmem:[%s2830_s1 + $0xa0] sm:$0xff]  ;;  %579 = vmatpush1.msra.mxu0 %v50_v38 }
  0x16   :  { %v175_v41 = vld [vmem:[%s2830_s1 + $0x4a8] sm:$0xff]  ;;  %v174_v43 = vld [vmem:[%s2830_s1 + $0x4a0] sm:$0xff]  ;;  %650 = vmatpush1.msra.mxu1 %v178_v39  ;;  %580 = vmatprep.subr.mxu0 %v47_v40 }
  0x17   :  { %v43_v44 = vld [vmem:[%s2830_s1 + $0x88] sm:$0xff]  ;;  %651 = vmatprep.subr.mxu1 %v175_v41  ;;  %v42_v46 = vld [vmem:[%s2830_s1 + $0x80] sm:$0xff]  ;;  %581 = vmatpush1.msra.mxu0 %v46_v42 }
  0x18   :  { %v171_v45 = vld [vmem:[%s2830_s1 + $0x488] sm:$0xff]  ;;  %v170_v47 = vld [vmem:[%s2830_s1 + $0x480] sm:$0xff]  ;;  %652 = vmatpush1.msra.mxu1 %v174_v43  ;;  %582 = vmatprep.subr.mxu0 %v43_v44 }
  0x19   :  { %v39_v48 = vld [vmem:[%s2830_s1 + $0x68] sm:$0xff]  ;;  %653 = vmatprep.subr.mxu1 %v171_v45  ;;  %v38_v50 = vld [vmem:[%s2830_s1 + $0x60] sm:$0xff]  ;;  %583 = vmatpush1.msra.mxu0 %v42_v46 }
  0x1a   :  { %v167_v49 = vld [vmem:[%s2830_s1 + $0x468] sm:$0xff]  ;;  %v166_v51 = vld [vmem:[%s2830_s1 + $0x460] sm:$0xff]  ;;  %654 = vmatpush1.msra.mxu1 %v170_v47  ;;  %584 = vmatprep.subr.mxu0 %v39_v48 }
  0x1b   :  { %v35_v52 = vld [vmem:[%s2830_s1 + $0x48] sm:$0xff]  ;;  %655 = vmatprep.subr.mxu1 %v167_v49  ;;  %v34_v54 = vld [vmem:[%s2830_s1 + $0x40] sm:$0xff]  ;;  %585 = vmatpush1.msra.mxu0 %v38_v50 }
  0x1c   :  { %v163_v53 = vld [vmem:[%s2830_s1 + $0x448] sm:$0xff]  ;;  %v162_v55 = vld [vmem:[%s2830_s1 + $0x440] sm:$0xff]  ;;  %656 = vmatpush1.msra.mxu1 %v166_v51  ;;  %586 = vmatprep.subr.mxu0 %v35_v52 }
  0x1d   :  { %v31_v56 = vld [vmem:[%s2830_s1 + $0x28] sm:$0xff]  ;;  %657 = vmatprep.subr.mxu1 %v163_v53  ;;  %v30_v58 = vld [vmem:[%s2830_s1 + $0x20] sm:$0xff]  ;;  %587 = vmatpush1.msra.mxu0 %v34_v54 }
  0x1e   :  { %v159_v57 = vld [vmem:[%s2830_s1 + $0x428] sm:$0xff]  ;;  %v158_v59 = vld [vmem:[%s2830_s1 + $0x420] sm:$0xff]  ;;  %658 = vmatpush1.msra.mxu1 %v162_v55  ;;  %588 = vmatprep.subr.mxu0 %v31_v56 }
  0x1f   :  { %v27_v60 = vld [vmem:[%s2830_s1 + $0x8] sm:$0xff]  ;;  %659 = vmatprep.subr.mxu1 %v159_v57  ;;  %v26_v62 = vld [vmem:[%s2830_s1] sm:$0xff]  ;;  %589 = vmatpush1.msra.mxu0 %v30_v58 }
  0x20   :  { %v155_v61 = vld [vmem:[%s2830_s1 + $0x408] sm:$0xff]  ;;  %v154_v63 = vld [vmem:[%s2830_s1 + $0x400] sm:$0xff]  ;;  %660 = vmatpush1.msra.mxu1 %v158_v59  ;;  %590 = vmatprep.subr.mxu0 %v27_v60 }
  0x21   :  { %v151_v0 = vld [vmem:[%s2830_s1 + $0x3e8] sm:$0xff]  ;;  %661 = vmatprep.subr.mxu1 %v155_v61  ;;  %v150_v2 = vld [vmem:[%s2830_s1 + $0x3e0] sm:$0xff]  ;;  %591 = vmatpush1.msra.mxu0 %v26_v62 }
  0x22   :  { %v279_v1 = vld [vmem:[%s2830_s1 + $0x7e8] sm:$0xff]  ;;  %v278_v3 = vld [vmem:[%s2830_s1 + $0x7e0] sm:$0xff]  ;;  %662 = vmatpush1.msra.mxu1 %v154_v63  ;;  %592 = vmatprep.subr.mxu0 %v151_v0 }
  0x23   :  { %v147_v4 = vld [vmem:[%s2830_s1 + $0x3c8] sm:$0xff]  ;;  %663 = vmatprep.subr.mxu1 %v279_v1  ;;  %v146_v6 = vld [vmem:[%s2830_s1 + $0x3c0] sm:$0xff]  ;;  %593 = vmatpush2.msra.mxu0 %v150_v2  ;;  %v21_v2 = vld [vmem:[%s2831_s0 + $0x18] sm:$0xff] }
  0x24   :  { %v275_v5 = vld [vmem:[%s2830_s1 + $0x7c8] sm:$0xff]  ;;  %v274_v7 = vld [vmem:[%s2830_s1 + $0x7c0] sm:$0xff]  ;;  %664 = vmatpush2.msra.mxu1 %v278_v3  ;;  %594 = vmatprep.subr.mxu0 %v147_v4 }
  0x25   :  { %v143_v8 = vld [vmem:[%s2830_s1 + $0x3a8] sm:$0xff]  ;;  %665 = vmatprep.subr.mxu1 %v275_v5  ;;  %v142_v10 = vld [vmem:[%s2830_s1 + $0x3a0] sm:$0xff]  ;;  %595 = vmatpush2.msra.mxu0 %v146_v6  ;;  %v20_v5 = vld [vmem:[%s2831_s0 + $0x10] sm:$0xff] }
  0x26   :  { %v271_v9 = vld [vmem:[%s2830_s1 + $0x7a8] sm:$0xff]  ;;  %v270_v11 = vld [vmem:[%s2830_s1 + $0x7a0] sm:$0xff]  ;;  %666 = vmatpush2.msra.mxu1 %v274_v7  ;;  %596 = vmatprep.subr.mxu0 %v143_v8 }
  0x27   :  { %v139_v12 = vld [vmem:[%s2830_s1 + $0x388] sm:$0xff]  ;;  %667 = vmatprep.subr.mxu1 %v271_v9  ;;  %v138_v14 = vld [vmem:[%s2830_s1 + $0x380] sm:$0xff]  ;;  %597 = vmatpush2.msra.mxu0 %v142_v10 }
  0x28   :  { %v267_v13 = vld [vmem:[%s2830_s1 + $0x788] sm:$0xff]  ;;  %v266_v15 = vld [vmem:[%s2830_s1 + $0x780] sm:$0xff]  ;;  %668 = vmatpush2.msra.mxu1 %v270_v11  ;;  %598 = vmatprep.subr.mxu0 %v139_v12 }
  0x29   :  { %v135_v16 = vld [vmem:[%s2830_s1 + $0x368] sm:$0xff]  ;;  %669 = vmatprep.subr.mxu1 %v267_v13  ;;  %v134_v18 = vld [vmem:[%s2830_s1 + $0x360] sm:$0xff]  ;;  %599 = vmatpush2.msra.mxu0 %v138_v14 }
  0x2a   :  { %v263_v17 = vld [vmem:[%s2830_s1 + $0x768] sm:$0xff]  ;;  %v262_v19 = vld [vmem:[%s2830_s1 + $0x760] sm:$0xff]  ;;  %670 = vmatpush2.msra.mxu1 %v266_v15  ;;  %600 = vmatprep.subr.mxu0 %v135_v16 }
  0x2b   :  { %v131_v20 = vld [vmem:[%s2830_s1 + $0x348] sm:$0xff]  ;;  %671 = vmatprep.subr.mxu1 %v263_v17  ;;  %v130_v22 = vld [vmem:[%s2830_s1 + $0x340] sm:$0xff]  ;;  %601 = vmatpush2.msra.mxu0 %v134_v18 }
  0x2c   :  { %v259_v21 = vld [vmem:[%s2830_s1 + $0x748] sm:$0xff]  ;;  %v258_v23 = vld [vmem:[%s2830_s1 + $0x740] sm:$0xff]  ;;  %672 = vmatpush2.msra.mxu1 %v262_v19  ;;  %602 = vmatprep.subr.mxu0 %v131_v20 }
  0x2d   :  { %v127_v24 = vld [vmem:[%s2830_s1 + $0x328] sm:$0xff]  ;;  %673 = vmatprep.subr.mxu1 %v259_v21  ;;  %v126_v26 = vld [vmem:[%s2830_s1 + $0x320] sm:$0xff]  ;;  %603 = vmatpush2.msra.mxu0 %v130_v22 }
  0x2e   :  { %v255_v25 = vld [vmem:[%s2830_s1 + $0x728] sm:$0xff]  ;;  %v254_v27 = vld [vmem:[%s2830_s1 + $0x720] sm:$0xff]  ;;  %674 = vmatpush2.msra.mxu1 %v258_v23  ;;  %604 = vmatprep.subr.mxu0 %v127_v24 }
  0x2f   :  { %v123_v28 = vld [vmem:[%s2830_s1 + $0x308] sm:$0xff]  ;;  %675 = vmatprep.subr.mxu1 %v255_v25  ;;  %v122_v30 = vld [vmem:[%s2830_s1 + $0x300] sm:$0xff]  ;;  %605 = vmatpush2.msra.mxu0 %v126_v26 }
  0x30   :  { %v251_v29 = vld [vmem:[%s2830_s1 + $0x708] sm:$0xff]  ;;  %v250_v31 = vld [vmem:[%s2830_s1 + $0x700] sm:$0xff]  ;;  %676 = vmatpush2.msra.mxu1 %v254_v27  ;;  %606 = vmatprep.subr.mxu0 %v123_v28 }
  0x31   :  { %v119_v32 = vld [vmem:[%s2830_s1 + $0x2e8] sm:$0xff]  ;;  %677 = vmatprep.subr.mxu1 %v251_v29  ;;  %v118_v34 = vld [vmem:[%s2830_s1 + $0x2e0] sm:$0xff]  ;;  %607 = vmatpush2.msra.mxu0 %v122_v30 }
  0x32   :  { %v247_v33 = vld [vmem:[%s2830_s1 + $0x6e8] sm:$0xff]  ;;  %v246_v35 = vld [vmem:[%s2830_s1 + $0x6e0] sm:$0xff]  ;;  %678 = vmatpush2.msra.mxu1 %v250_v31  ;;  %608 = vmatprep.subr.mxu0 %v119_v32 }
  0x33   :  { %v115_v36 = vld [vmem:[%s2830_s1 + $0x2c8] sm:$0xff]  ;;  %679 = vmatprep.subr.mxu1 %v247_v33  ;;  %v114_v38 = vld [vmem:[%s2830_s1 + $0x2c0] sm:$0xff]  ;;  %609 = vmatpush2.msra.mxu0 %v118_v34 }
  0x34   :  { %v243_v37 = vld [vmem:[%s2830_s1 + $0x6c8] sm:$0xff]  ;;  %v242_v39 = vld [vmem:[%s2830_s1 + $0x6c0] sm:$0xff]  ;;  %680 = vmatpush2.msra.mxu1 %v246_v35  ;;  %610 = vmatprep.subr.mxu0 %v115_v36 }
  0x35   :  { %v111_v40 = vld [vmem:[%s2830_s1 + $0x2a8] sm:$0xff]  ;;  %681 = vmatprep.subr.mxu1 %v243_v37  ;;  %v110_v42 = vld [vmem:[%s2830_s1 + $0x2a0] sm:$0xff]  ;;  %611 = vmatpush2.msra.mxu0 %v114_v38 }
  0x36   :  { %v239_v41 = vld [vmem:[%s2830_s1 + $0x6a8] sm:$0xff]  ;;  %v238_v43 = vld [vmem:[%s2830_s1 + $0x6a0] sm:$0xff]  ;;  %682 = vmatpush2.msra.mxu1 %v242_v39  ;;  %612 = vmatprep.subr.mxu0 %v111_v40 }
  0x37   :  { %v107_v44 = vld [vmem:[%s2830_s1 + $0x288] sm:$0xff]  ;;  %683 = vmatprep.subr.mxu1 %v239_v41  ;;  %v106_v46 = vld [vmem:[%s2830_s1 + $0x280] sm:$0xff]  ;;  %613 = vmatpush2.msra.mxu0 %v110_v42 }
  0x38   :  { %v235_v45 = vld [vmem:[%s2830_s1 + $0x688] sm:$0xff]  ;;  %v234_v47 = vld [vmem:[%s2830_s1 + $0x680] sm:$0xff]  ;;  %684 = vmatpush2.msra.mxu1 %v238_v43  ;;  %614 = vmatprep.subr.mxu0 %v107_v44 }
  0x39   :  { %v103_v48 = vld [vmem:[%s2830_s1 + $0x268] sm:$0xff]  ;;  %685 = vmatprep.subr.mxu1 %v235_v45  ;;  %v102_v50 = vld [vmem:[%s2830_s1 + $0x260] sm:$0xff]  ;;  %615 = vmatpush2.msra.mxu0 %v106_v46 }
  0x3a   :  { %v231_v49 = vld [vmem:[%s2830_s1 + $0x668] sm:$0xff]  ;;  %v230_v51 = vld [vmem:[%s2830_s1 + $0x660] sm:$0xff]  ;;  %686 = vmatpush2.msra.mxu1 %v234_v47  ;;  %616 = vmatprep.subr.mxu0 %v103_v48 }
  0x3b   :  { %v99_v52 = vld [vmem:[%s2830_s1 + $0x248] sm:$0xff]  ;;  %687 = vmatprep.subr.mxu1 %v231_v49  ;;  %v98_v54 = vld [vmem:[%s2830_s1 + $0x240] sm:$0xff]  ;;  %617 = vmatpush2.msra.mxu0 %v102_v50 }
  0x3c   :  { %v227_v53 = vld [vmem:[%s2830_s1 + $0x648] sm:$0xff]  ;;  %v226_v55 = vld [vmem:[%s2830_s1 + $0x640] sm:$0xff]  ;;  %688 = vmatpush2.msra.mxu1 %v230_v51  ;;  %618 = vmatprep.subr.mxu0 %v99_v52 }
  0x3d   :  { %v95_v56 = vld [vmem:[%s2830_s1 + $0x228] sm:$0xff]  ;;  %689 = vmatprep.subr.mxu1 %v227_v53  ;;  %v94_v58 = vld [vmem:[%s2830_s1 + $0x220] sm:$0xff]  ;;  %619 = vmatpush2.msra.mxu0 %v98_v54 }
  0x3e   :  { %v223_v57 = vld [vmem:[%s2830_s1 + $0x628] sm:$0xff]  ;;  %v222_v59 = vld [vmem:[%s2830_s1 + $0x620] sm:$0xff]  ;;  %690 = vmatpush2.msra.mxu1 %v226_v55  ;;  %620 = vmatprep.subr.mxu0 %v95_v56 }
  0x3f   :  { %v91_v60 = vld [vmem:[%s2830_s1 + $0x208] sm:$0xff]  ;;  %691 = vmatprep.subr.mxu1 %v223_v57  ;;  %v90_v62 = vld [vmem:[%s2830_s1 + $0x200] sm:$0xff]  ;;  %621 = vmatpush2.msra.mxu0 %v94_v58 }
  0x40   :  { %v219_v61 = vld [vmem:[%s2830_s1 + $0x608] sm:$0xff]  ;;  %692 = vmatpush2.msra.mxu1 %v222_v59  ;;  %v218_v0 = vld [vmem:[%s2830_s1 + $0x600] sm:$0xff]  ;;  %622 = vmatprep.subr.mxu0 %v91_v60 }
  0x41   :  { %v19_v63 = vld [vmem:[%s2831_s0 + $0x8] sm:$0xff]  ;;  %v18_v1 = vld [vmem:[%s2831_s0] sm:$0xff]  ;;  %693 = vmatprep.subr.mxu1 %v219_v61  ;;  %623 = vmatpush2.msra.mxu0 %v90_v62 }
  0x42   :  { %v343_v3 = vld [vmem:[%s2830_s1 + $0x9e8] sm:$0xff]  ;;  %624 = vmatprep.mubr.f32.mxu0 %v19_v63  ;;  %694 = vmatpush2.msra.mxu1 %v218_v0  ;;  %v342_v6 = vld [vmem:[%s2830_s1 + $0x9e0] sm:$0xff] }
  0x43   :  { %v471_v4 = vld [vmem:[%s2830_s1 + $0xde8] sm:$0xff]  ;;  %625 = vmatmul.mubr.f32.vlgmr.msra.gmra.mxu0 %v18_v1  ;;  %v470_v7 = vld [vmem:[%s2830_s1 + $0xde0] sm:$0xff]  ;;  %695 = vmatprep.mubr.f32.mxu1 %v21_v2 }
  0x44   :  { %702 = vmatprep.subr.mxu0 %v343_v3  ;;  %v339_v8 = vld [vmem:[%s2830_s1 + $0x9c8] sm:$0xff]  ;;  %773 = vmatprep.subr.mxu1 %v471_v4  ;;  %v338_v10 = vld [vmem:[%s2830_s1 + $0x9c0] sm:$0xff] }
  0x45   :  { %v467_v9 = vld [vmem:[%s2830_s1 + $0xdc8] sm:$0xff]  ;;  %696 = vmatmul.mubr.f32.vlgmr.msra.gmra.mxu1 %v20_v5  ;;  %v466_v11 = vld [vmem:[%s2830_s1 + $0xdc0] sm:$0xff]  ;;  %703 = vmatpush1.msra.mxu0 %v342_v6 }
  0x46   :  { %774 = vmatpush1.msra.mxu1 %v470_v7  ;;  %v335_v12 = vld [vmem:[%s2830_s1 + $0x9a8] sm:$0xff]  ;;  %704 = vmatprep.subr.mxu0 %v339_v8  ;;  %v334_v14 = vld [vmem:[%s2830_s1 + $0x9a0] sm:$0xff] }
  0x47   :  { %v463_v13 = vld [vmem:[%s2830_s1 + $0xda8] sm:$0xff]  ;;  %775 = vmatprep.subr.mxu1 %v467_v9  ;;  %v462_v15 = vld [vmem:[%s2830_s1 + $0xda0] sm:$0xff]  ;;  %705 = vmatpush1.msra.mxu0 %v338_v10 }
  0x48   :  { %776 = vmatpush1.msra.mxu1 %v466_v11  ;;  %v331_v16 = vld [vmem:[%s2830_s1 + $0x988] sm:$0xff]  ;;  %706 = vmatprep.subr.mxu0 %v335_v12  ;;  %v330_v18 = vld [vmem:[%s2830_s1 + $0x980] sm:$0xff] }
  0x49   :  { %v459_v17 = vld [vmem:[%s2830_s1 + $0xd88] sm:$0xff]  ;;  %777 = vmatprep.subr.mxu1 %v463_v13  ;;  %v458_v19 = vld [vmem:[%s2830_s1 + $0xd80] sm:$0xff]  ;;  %707 = vmatpush1.msra.mxu0 %v334_v14 }
  0x4a   :  { %778 = vmatpush1.msra.mxu1 %v462_v15  ;;  %v327_v20 = vld [vmem:[%s2830_s1 + $0x968] sm:$0xff]  ;;  %708 = vmatprep.subr.mxu0 %v331_v16  ;;  %v326_v22 = vld [vmem:[%s2830_s1 + $0x960] sm:$0xff] }
  0x4b   :  { %v455_v21 = vld [vmem:[%s2830_s1 + $0xd68] sm:$0xff]  ;;  %779 = vmatprep.subr.mxu1 %v459_v17  ;;  %v454_v23 = vld [vmem:[%s2830_s1 + $0xd60] sm:$0xff]  ;;  %709 = vmatpush1.msra.mxu0 %v330_v18 }
  0x4c   :  { %780 = vmatpush1.msra.mxu1 %v458_v19  ;;  %v323_v24 = vld [vmem:[%s2830_s1 + $0x948] sm:$0xff]  ;;  %710 = vmatprep.subr.mxu0 %v327_v20  ;;  %v322_v26 = vld [vmem:[%s2830_s1 + $0x940] sm:$0xff] }
  0x4d   :  { %v451_v25 = vld [vmem:[%s2830_s1 + $0xd48] sm:$0xff]  ;;  %781 = vmatprep.subr.mxu1 %v455_v21  ;;  %v450_v27 = vld [vmem:[%s2830_s1 + $0xd40] sm:$0xff]  ;;  %711 = vmatpush1.msra.mxu0 %v326_v22 }
  0x4e   :  { %782 = vmatpush1.msra.mxu1 %v454_v23  ;;  %v319_v28 = vld [vmem:[%s2830_s1 + $0x928] sm:$0xff]  ;;  %712 = vmatprep.subr.mxu0 %v323_v24  ;;  %v318_v30 = vld [vmem:[%s2830_s1 + $0x920] sm:$0xff] }
  0x4f   :  { %v447_v29 = vld [vmem:[%s2830_s1 + $0xd28] sm:$0xff]  ;;  %783 = vmatprep.subr.mxu1 %v451_v25  ;;  %v446_v31 = vld [vmem:[%s2830_s1 + $0xd20] sm:$0xff]  ;;  %713 = vmatpush1.msra.mxu0 %v322_v26 }
  0x50   :  { %784 = vmatpush1.msra.mxu1 %v450_v27  ;;  %v315_v32 = vld [vmem:[%s2830_s1 + $0x908] sm:$0xff]  ;;  %714 = vmatprep.subr.mxu0 %v319_v28  ;;  %v314_v34 = vld [vmem:[%s2830_s1 + $0x900] sm:$0xff] }
  0x51   :  { %v443_v33 = vld [vmem:[%s2830_s1 + $0xd08] sm:$0xff]  ;;  %785 = vmatprep.subr.mxu1 %v447_v29  ;;  %v442_v35 = vld [vmem:[%s2830_s1 + $0xd00] sm:$0xff]  ;;  %715 = vmatpush1.msra.mxu0 %v318_v30 }
  0x52   :  { %786 = vmatpush1.msra.mxu1 %v446_v31  ;;  %v311_v36 = vld [vmem:[%s2830_s1 + $0x8e8] sm:$0xff]  ;;  %716 = vmatprep.subr.mxu0 %v315_v32  ;;  %v310_v38 = vld [vmem:[%s2830_s1 + $0x8e0] sm:$0xff] }
  0x53   :  { %v439_v37 = vld [vmem:[%s2830_s1 + $0xce8] sm:$0xff]  ;;  %787 = vmatprep.subr.mxu1 %v443_v33  ;;  %v438_v39 = vld [vmem:[%s2830_s1 + $0xce0] sm:$0xff]  ;;  %717 = vmatpush1.msra.mxu0 %v314_v34 }
  0x54   :  { %788 = vmatpush1.msra.mxu1 %v442_v35  ;;  %v307_v40 = vld [vmem:[%s2830_s1 + $0x8c8] sm:$0xff]  ;;  %718 = vmatprep.subr.mxu0 %v311_v36  ;;  %v306_v42 = vld [vmem:[%s2830_s1 + $0x8c0] sm:$0xff] }
  0x55   :  { %v435_v41 = vld [vmem:[%s2830_s1 + $0xcc8] sm:$0xff]  ;;  %789 = vmatprep.subr.mxu1 %v439_v37  ;;  %v434_v43 = vld [vmem:[%s2830_s1 + $0xcc0] sm:$0xff]  ;;  %719 = vmatpush1.msra.mxu0 %v310_v38 }
  0x56   :  { %790 = vmatpush1.msra.mxu1 %v438_v39  ;;  %v303_v44 = vld [vmem:[%s2830_s1 + $0x8a8] sm:$0xff]  ;;  %720 = vmatprep.subr.mxu0 %v307_v40  ;;  %v302_v46 = vld [vmem:[%s2830_s1 + $0x8a0] sm:$0xff] }
  0x57   :  { %v431_v45 = vld [vmem:[%s2830_s1 + $0xca8] sm:$0xff]  ;;  %791 = vmatprep.subr.mxu1 %v435_v41  ;;  %v430_v47 = vld [vmem:[%s2830_s1 + $0xca0] sm:$0xff]  ;;  %721 = vmatpush1.msra.mxu0 %v306_v42 }
  0x58   :  { %792 = vmatpush1.msra.mxu1 %v434_v43  ;;  %v299_v48 = vld [vmem:[%s2830_s1 + $0x888] sm:$0xff]  ;;  %722 = vmatprep.subr.mxu0 %v303_v44  ;;  %v298_v50 = vld [vmem:[%s2830_s1 + $0x880] sm:$0xff] }
  0x59   :  { %v427_v49 = vld [vmem:[%s2830_s1 + $0xc88] sm:$0xff]  ;;  %793 = vmatprep.subr.mxu1 %v431_v45  ;;  %v426_v51 = vld [vmem:[%s2830_s1 + $0xc80] sm:$0xff]  ;;  %723 = vmatpush1.msra.mxu0 %v302_v46 }
  0x5a   :  { %794 = vmatpush1.msra.mxu1 %v430_v47  ;;  %v295_v52 = vld [vmem:[%s2830_s1 + $0x868] sm:$0xff]  ;;  %724 = vmatprep.subr.mxu0 %v299_v48  ;;  %v294_v54 = vld [vmem:[%s2830_s1 + $0x860] sm:$0xff] }
  0x5b   :  { %v423_v53 = vld [vmem:[%s2830_s1 + $0xc68] sm:$0xff]  ;;  %795 = vmatprep.subr.mxu1 %v427_v49  ;;  %v422_v55 = vld [vmem:[%s2830_s1 + $0xc60] sm:$0xff]  ;;  %725 = vmatpush1.msra.mxu0 %v298_v50 }
  0x5c   :  { %796 = vmatpush1.msra.mxu1 %v426_v51  ;;  %v291_v56 = vld [vmem:[%s2830_s1 + $0x848] sm:$0xff]  ;;  %726 = vmatprep.subr.mxu0 %v295_v52  ;;  %v290_v58 = vld [vmem:[%s2830_s1 + $0x840] sm:$0xff] }
  0x5d   :  { %v419_v57 = vld [vmem:[%s2830_s1 + $0xc48] sm:$0xff]  ;;  %797 = vmatprep.subr.mxu1 %v423_v53  ;;  %v418_v59 = vld [vmem:[%s2830_s1 + $0xc40] sm:$0xff]  ;;  %727 = vmatpush1.msra.mxu0 %v294_v54 }
  0x5e   :  { %798 = vmatpush1.msra.mxu1 %v422_v55  ;;  %v287_v60 = vld [vmem:[%s2830_s1 + $0x828] sm:$0xff]  ;;  %728 = vmatprep.subr.mxu0 %v291_v56  ;;  %v286_v62 = vld [vmem:[%s2830_s1 + $0x820] sm:$0xff] }
  0x5f   :  { %v415_v61 = vld [vmem:[%s2830_s1 + $0xc28] sm:$0xff]  ;;  %799 = vmatprep.subr.mxu1 %v419_v57  ;;  %v414_v63 = vld [vmem:[%s2830_s1 + $0xc20] sm:$0xff]  ;;  %729 = vmatpush1.msra.mxu0 %v290_v58 }
  0x60   :  { %800 = vmatpush1.msra.mxu1 %v418_v59  ;;  %v283_v0 = vld [vmem:[%s2830_s1 + $0x808] sm:$0xff]  ;;  %730 = vmatprep.subr.mxu0 %v287_v60  ;;  %v282_v2 = vld [vmem:[%s2830_s1 + $0x800] sm:$0xff] }
  0x61   :  { %v411_v1 = vld [vmem:[%s2830_s1 + $0xc08] sm:$0xff]  ;;  %801 = vmatprep.subr.mxu1 %v415_v61  ;;  %v410_v3 = vld [vmem:[%s2830_s1 + $0xc00] sm:$0xff]  ;;  %731 = vmatpush1.msra.mxu0 %v286_v62 }
  0x62   :  { %802 = vmatpush1.msra.mxu1 %v414_v63  ;;  %v407_v4 = vld [vmem:[%s2830_s1 + $0xbe8] sm:$0xff]  ;;  %732 = vmatprep.subr.mxu0 %v283_v0  ;;  %v406_v6 = vld [vmem:[%s2830_s1 + $0xbe0] sm:$0xff] }
  0x63   :  { %v535_v5 = vld [vmem:[%s2830_s1 + $0xfe8] sm:$0xff]  ;;  %803 = vmatprep.subr.mxu1 %v411_v1  ;;  %v534_v7 = vld [vmem:[%s2830_s1 + $0xfe0] sm:$0xff]  ;;  %733 = vmatpush1.msra.mxu0 %v282_v2 }
  0x64   :  { %804 = vmatpush1.msra.mxu1 %v410_v3  ;;  %v403_v8 = vld [vmem:[%s2830_s1 + $0xbc8] sm:$0xff]  ;;  %734 = vmatprep.subr.mxu0 %v407_v4  ;;  %v402_v10 = vld [vmem:[%s2830_s1 + $0xbc0] sm:$0xff] }
  0x65   :  { %v531_v9 = vld [vmem:[%s2830_s1 + $0xfc8] sm:$0xff]  ;;  %805 = vmatprep.subr.mxu1 %v535_v5  ;;  %v530_v11 = vld [vmem:[%s2830_s1 + $0xfc0] sm:$0xff]  ;;  %735 = vmatpush2.msra.mxu0 %v406_v6  ;;  %v25_v6 = vld [vmem:[%s2831_s0 + $0x38] sm:$0xff] }
  0x66   :  { %806 = vmatpush2.msra.mxu1 %v534_v7  ;;  %v399_v12 = vld [vmem:[%s2830_s1 + $0xba8] sm:$0xff]  ;;  %736 = vmatprep.subr.mxu0 %v403_v8  ;;  %v398_v14 = vld [vmem:[%s2830_s1 + $0xba0] sm:$0xff]  ;;  %v89_v7 = vld [vmem:[%s2830_s1 + $0x1f8] sm:$0xff] }
  0x67   :  { %v527_v13 = vld [vmem:[%s2830_s1 + $0xfa8] sm:$0xff]  ;;  %807 = vmatprep.subr.mxu1 %v531_v9  ;;  %v526_v15 = vld [vmem:[%s2830_s1 + $0xfa0] sm:$0xff]  ;;  %737 = vmatpush2.msra.mxu0 %v402_v10  ;;  %v217_v8 = vld [vmem:[%s2830_s1 + $0x5f8] sm:$0xff] }
  0x68   :  { %808 = vmatpush2.msra.mxu1 %v530_v11  ;;  %v395_v16 = vld [vmem:[%s2830_s1 + $0xb88] sm:$0xff]  ;;  %738 = vmatprep.subr.mxu0 %v399_v12  ;;  %v394_v18 = vld [vmem:[%s2830_s1 + $0xb80] sm:$0xff]  ;;  %v24_v9 = vld [vmem:[%s2831_s0 + $0x30] sm:$0xff] }
  0x69   :  { %v523_v17 = vld [vmem:[%s2830_s1 + $0xf88] sm:$0xff]  ;;  %809 = vmatprep.subr.mxu1 %v527_v13  ;;  %v522_v19 = vld [vmem:[%s2830_s1 + $0xf80] sm:$0xff]  ;;  %739 = vmatpush2.msra.mxu0 %v398_v14  ;;  %v88_v10 = vld [vmem:[%s2830_s1 + $0x1f0] sm:$0xff] }
  0x6a   :  { %810 = vmatpush2.msra.mxu1 %v526_v15  ;;  %v391_v20 = vld [vmem:[%s2830_s1 + $0xb68] sm:$0xff]  ;;  %740 = vmatprep.subr.mxu0 %v395_v16  ;;  %v390_v22 = vld [vmem:[%s2830_s1 + $0xb60] sm:$0xff]  ;;  %v216_v11 = vld [vmem:[%s2830_s1 + $0x5f0] sm:$0xff] }
  0x6b   :  { %v519_v21 = vld [vmem:[%s2830_s1 + $0xf68] sm:$0xff]  ;;  %811 = vmatprep.subr.mxu1 %v523_v17  ;;  %v518_v23 = vld [vmem:[%s2830_s1 + $0xf60] sm:$0xff]  ;;  %741 = vmatpush2.msra.mxu0 %v394_v18  ;;  %v85_v12 = vld [vmem:[%s2830_s1 + $0x1d8] sm:$0xff] }
  0x6c   :  { %812 = vmatpush2.msra.mxu1 %v522_v19  ;;  %v387_v24 = vld [vmem:[%s2830_s1 + $0xb48] sm:$0xff]  ;;  %742 = vmatprep.subr.mxu0 %v391_v20  ;;  %v386_v26 = vld [vmem:[%s2830_s1 + $0xb40] sm:$0xff]  ;;  %v213_v13 = vld [vmem:[%s2830_s1 + $0x5d8] sm:$0xff] }
  0x6d   :  { %v515_v25 = vld [vmem:[%s2830_s1 + $0xf48] sm:$0xff]  ;;  %813 = vmatprep.subr.mxu1 %v519_v21  ;;  %v514_v27 = vld [vmem:[%s2830_s1 + $0xf40] sm:$0xff]  ;;  %743 = vmatpush2.msra.mxu0 %v390_v22  ;;  %v84_v14 = vld [vmem:[%s2830_s1 + $0x1d0] sm:$0xff] }
  0x6e   :  { %814 = vmatpush2.msra.mxu1 %v518_v23  ;;  %v383_v28 = vld [vmem:[%s2830_s1 + $0xb28] sm:$0xff]  ;;  %744 = vmatprep.subr.mxu0 %v387_v24  ;;  %v382_v30 = vld [vmem:[%s2830_s1 + $0xb20] sm:$0xff]  ;;  %v212_v15 = vld [vmem:[%s2830_s1 + $0x5d0] sm:$0xff] }
  0x6f   :  { %v511_v29 = vld [vmem:[%s2830_s1 + $0xf28] sm:$0xff]  ;;  %815 = vmatprep.subr.mxu1 %v515_v25  ;;  %v510_v31 = vld [vmem:[%s2830_s1 + $0xf20] sm:$0xff]  ;;  %745 = vmatpush2.msra.mxu0 %v386_v26  ;;  %v81_v16 = vld [vmem:[%s2830_s1 + $0x1b8] sm:$0xff] }
  0x70   :  { %816 = vmatpush2.msra.mxu1 %v514_v27  ;;  %v379_v32 = vld [vmem:[%s2830_s1 + $0xb08] sm:$0xff]  ;;  %746 = vmatprep.subr.mxu0 %v383_v28  ;;  %v378_v34 = vld [vmem:[%s2830_s1 + $0xb00] sm:$0xff]  ;;  %v209_v17 = vld [vmem:[%s2830_s1 + $0x5b8] sm:$0xff] }
  0x71   :  { %v507_v33 = vld [vmem:[%s2830_s1 + $0xf08] sm:$0xff]  ;;  %817 = vmatprep.subr.mxu1 %v511_v29  ;;  %v506_v35 = vld [vmem:[%s2830_s1 + $0xf00] sm:$0xff]  ;;  %747 = vmatpush2.msra.mxu0 %v382_v30  ;;  %v80_v18 = vld [vmem:[%s2830_s1 + $0x1b0] sm:$0xff] }
  0x72   :  { %818 = vmatpush2.msra.mxu1 %v510_v31  ;;  %v375_v36 = vld [vmem:[%s2830_s1 + $0xae8] sm:$0xff]  ;;  %748 = vmatprep.subr.mxu0 %v379_v32  ;;  %v374_v38 = vld [vmem:[%s2830_s1 + $0xae0] sm:$0xff]  ;;  %v208_v19 = vld [vmem:[%s2830_s1 + $0x5b0] sm:$0xff] }
  0x73   :  { %v503_v37 = vld [vmem:[%s2830_s1 + $0xee8] sm:$0xff]  ;;  %819 = vmatprep.subr.mxu1 %v507_v33  ;;  %v502_v39 = vld [vmem:[%s2830_s1 + $0xee0] sm:$0xff]  ;;  %749 = vmatpush2.msra.mxu0 %v378_v34  ;;  %v77_v20 = vld [vmem:[%s2830_s1 + $0x198] sm:$0xff] }
  0x74   :  { %820 = vmatpush2.msra.mxu1 %v506_v35  ;;  %v371_v40 = vld [vmem:[%s2830_s1 + $0xac8] sm:$0xff]  ;;  %750 = vmatprep.subr.mxu0 %v375_v36  ;;  %v370_v42 = vld [vmem:[%s2830_s1 + $0xac0] sm:$0xff]  ;;  %v205_v21 = vld [vmem:[%s2830_s1 + $0x598] sm:$0xff] }
  0x75   :  { %v499_v41 = vld [vmem:[%s2830_s1 + $0xec8] sm:$0xff]  ;;  %821 = vmatprep.subr.mxu1 %v503_v37  ;;  %v498_v43 = vld [vmem:[%s2830_s1 + $0xec0] sm:$0xff]  ;;  %751 = vmatpush2.msra.mxu0 %v374_v38  ;;  %v76_v22 = vld [vmem:[%s2830_s1 + $0x190] sm:$0xff] }
  0x76   :  { %822 = vmatpush2.msra.mxu1 %v502_v39  ;;  %v367_v44 = vld [vmem:[%s2830_s1 + $0xaa8] sm:$0xff]  ;;  %752 = vmatprep.subr.mxu0 %v371_v40  ;;  %v366_v46 = vld [vmem:[%s2830_s1 + $0xaa0] sm:$0xff]  ;;  %v204_v23 = vld [vmem:[%s2830_s1 + $0x590] sm:$0xff] }
  0x77   :  { %v495_v45 = vld [vmem:[%s2830_s1 + $0xea8] sm:$0xff]  ;;  %823 = vmatprep.subr.mxu1 %v499_v41  ;;  %v494_v47 = vld [vmem:[%s2830_s1 + $0xea0] sm:$0xff]  ;;  %753 = vmatpush2.msra.mxu0 %v370_v42  ;;  %v73_v24 = vld [vmem:[%s2830_s1 + $0x178] sm:$0xff] }
  0x78   :  { %824 = vmatpush2.msra.mxu1 %v498_v43  ;;  %v363_v48 = vld [vmem:[%s2830_s1 + $0xa88] sm:$0xff]  ;;  %754 = vmatprep.subr.mxu0 %v367_v44  ;;  %v362_v50 = vld [vmem:[%s2830_s1 + $0xa80] sm:$0xff]  ;;  %v201_v25 = vld [vmem:[%s2830_s1 + $0x578] sm:$0xff] }
  0x79   :  { %v491_v49 = vld [vmem:[%s2830_s1 + $0xe88] sm:$0xff]  ;;  %825 = vmatprep.subr.mxu1 %v495_v45  ;;  %v490_v51 = vld [vmem:[%s2830_s1 + $0xe80] sm:$0xff]  ;;  %755 = vmatpush2.msra.mxu0 %v366_v46  ;;  %v72_v26 = vld [vmem:[%s2830_s1 + $0x170] sm:$0xff] }
  0x7a   :  { %826 = vmatpush2.msra.mxu1 %v494_v47  ;;  %v359_v52 = vld [vmem:[%s2830_s1 + $0xa68] sm:$0xff]  ;;  %756 = vmatprep.subr.mxu0 %v363_v48  ;;  %v358_v54 = vld [vmem:[%s2830_s1 + $0xa60] sm:$0xff]  ;;  %v200_v27 = vld [vmem:[%s2830_s1 + $0x570] sm:$0xff] }
  0x7b   :  { %v487_v53 = vld [vmem:[%s2830_s1 + $0xe68] sm:$0xff]  ;;  %827 = vmatprep.subr.mxu1 %v491_v49  ;;  %v486_v55 = vld [vmem:[%s2830_s1 + $0xe60] sm:$0xff]  ;;  %757 = vmatpush2.msra.mxu0 %v362_v50  ;;  %v69_v28 = vld [vmem:[%s2830_s1 + $0x158] sm:$0xff] }
  0x7c   :  { %828 = vmatpush2.msra.mxu1 %v490_v51  ;;  %v355_v56 = vld [vmem:[%s2830_s1 + $0xa48] sm:$0xff]  ;;  %758 = vmatprep.subr.mxu0 %v359_v52  ;;  %v354_v58 = vld [vmem:[%s2830_s1 + $0xa40] sm:$0xff]  ;;  %v197_v29 = vld [vmem:[%s2830_s1 + $0x558] sm:$0xff] }
  0x7d   :  { %v483_v57 = vld [vmem:[%s2830_s1 + $0xe48] sm:$0xff]  ;;  %829 = vmatprep.subr.mxu1 %v487_v53  ;;  %v482_v59 = vld [vmem:[%s2830_s1 + $0xe40] sm:$0xff]  ;;  %759 = vmatpush2.msra.mxu0 %v358_v54  ;;  %v68_v30 = vld [vmem:[%s2830_s1 + $0x150] sm:$0xff] }
  0x7e   :  { %830 = vmatpush2.msra.mxu1 %v486_v55  ;;  %v351_v60 = vld [vmem:[%s2830_s1 + $0xa28] sm:$0xff]  ;;  %760 = vmatprep.subr.mxu0 %v355_v56  ;;  %v350_v62 = vld [vmem:[%s2830_s1 + $0xa20] sm:$0xff]  ;;  %v196_v31 = vld [vmem:[%s2830_s1 + $0x550] sm:$0xff] }
  0x7f   :  { %v479_v61 = vld [vmem:[%s2830_s1 + $0xe28] sm:$0xff]  ;;  %831 = vmatprep.subr.mxu1 %v483_v57  ;;  %v478_v63 = vld [vmem:[%s2830_s1 + $0xe20] sm:$0xff]  ;;  %761 = vmatpush2.msra.mxu0 %v354_v58  ;;  %v65_v32 = vld [vmem:[%s2830_s1 + $0x138] sm:$0xff] }
  0x80   :  { %832 = vmatpush2.msra.mxu1 %v482_v59  ;;  %v347_v0 = vld [vmem:[%s2830_s1 + $0xa08] sm:$0xff]  ;;  %762 = vmatprep.subr.mxu0 %v351_v60  ;;  %v346_v2 = vld [vmem:[%s2830_s1 + $0xa00] sm:$0xff]  ;;  %v193_v33 = vld [vmem:[%s2830_s1 + $0x538] sm:$0xff] }
  0x81   :  { %v475_v1 = vld [vmem:[%s2830_s1 + $0xe08] sm:$0xff]  ;;  %833 = vmatprep.subr.mxu1 %v479_v61  ;;  %763 = vmatpush2.msra.mxu0 %v350_v62  ;;  %v474_v4 = vld [vmem:[%s2830_s1 + $0xe00] sm:$0xff]  ;;  %v64_v34 = vld [vmem:[%s2830_s1 + $0x130] sm:$0xff] }
  0x82   :  { %v23_v3 = vld [vmem:[%s2831_s0 + $0x28] sm:$0xff]  ;;  %834 = vmatpush2.msra.mxu1 %v478_v63  ;;  %v22_v5 = vld [vmem:[%s2831_s0 + $0x20] sm:$0xff]  ;;  %764 = vmatprep.subr.mxu0 %v347_v0  ;;  %v192_v35 = vld [vmem:[%s2830_s1 + $0x530] sm:$0xff] }
  0x83   :  { %835 = vmatprep.subr.mxu1 %v475_v1  ;;  %765 = vmatpush2.msra.mxu0 %v346_v2  ;;  %v61_v36 = vld [vmem:[%s2830_s1 + $0x118] sm:$0xff]  ;;  %v60_v38 = vld [vmem:[%s2830_s1 + $0x110] sm:$0xff] }
  0x84   :  { %766 = vmatprep.mubr.f32.mxu0 %v23_v3  ;;  %836 = vmatpush2.msra.mxu1 %v474_v4  ;;  %v189_v37 = vld [vmem:[%s2830_s1 + $0x518] sm:$0xff]  ;;  %v188_v39 = vld [vmem:[%s2830_s1 + $0x510] sm:$0xff] }
  0x85   :  { %767 = vmatmul.mubr.f32.vlgmr.msra.gmra.mxu0 %v22_v5  ;;  %837 = vmatprep.mubr.f32.mxu1 %v25_v6  ;;  %v57_v40 = vld [vmem:[%s2830_s1 + $0xf8] sm:$0xff]  ;;  %v56_v42 = vld [vmem:[%s2830_s1 + $0xf0] sm:$0xff] }
  0x86   :  { %844 = vmatprep.subr.mxu0 %v89_v7  ;;  %915 = vmatprep.subr.mxu1 %v217_v8  ;;  %v185_v41 = vld [vmem:[%s2830_s1 + $0x4f8] sm:$0xff]  ;;  %v184_v43 = vld [vmem:[%s2830_s1 + $0x4f0] sm:$0xff] }
  0x87   :  { %838 = vmatmul.mubr.f32.vlgmr.msra.gmra.mxu1 %v24_v9  ;;  %845 = vmatpush1.msra.mxu0 %v88_v10  ;;  %v53_v44 = vld [vmem:[%s2830_s1 + $0xd8] sm:$0xff]  ;;  %v52_v46 = vld [vmem:[%s2830_s1 + $0xd0] sm:$0xff] }
  0x88   :  { %916 = vmatpush1.msra.mxu1 %v216_v11  ;;  %846 = vmatprep.subr.mxu0 %v85_v12  ;;  %v181_v45 = vld [vmem:[%s2830_s1 + $0x4d8] sm:$0xff]  ;;  %v180_v47 = vld [vmem:[%s2830_s1 + $0x4d0] sm:$0xff] }
  0x89   :  { %917 = vmatprep.subr.mxu1 %v213_v13  ;;  %847 = vmatpush1.msra.mxu0 %v84_v14  ;;  %v49_v48 = vld [vmem:[%s2830_s1 + $0xb8] sm:$0xff]  ;;  %v48_v50 = vld [vmem:[%s2830_s1 + $0xb0] sm:$0xff] }
  0x8a   :  { %918 = vmatpush1.msra.mxu1 %v212_v15  ;;  %848 = vmatprep.subr.mxu0 %v81_v16  ;;  %v177_v49 = vld [vmem:[%s2830_s1 + $0x4b8] sm:$0xff]  ;;  %v176_v51 = vld [vmem:[%s2830_s1 + $0x4b0] sm:$0xff] }
  0x8b   :  { %919 = vmatprep.subr.mxu1 %v209_v17  ;;  %849 = vmatpush1.msra.mxu0 %v80_v18  ;;  %v45_v52 = vld [vmem:[%s2830_s1 + $0x98] sm:$0xff]  ;;  %v44_v54 = vld [vmem:[%s2830_s1 + $0x90] sm:$0xff] }
  0x8c   :  { %920 = vmatpush1.msra.mxu1 %v208_v19  ;;  %850 = vmatprep.subr.mxu0 %v77_v20  ;;  %v173_v53 = vld [vmem:[%s2830_s1 + $0x498] sm:$0xff]  ;;  %v172_v55 = vld [vmem:[%s2830_s1 + $0x490] sm:$0xff] }
  0x8d   :  { %921 = vmatprep.subr.mxu1 %v205_v21  ;;  %851 = vmatpush1.msra.mxu0 %v76_v22  ;;  %v41_v56 = vld [vmem:[%s2830_s1 + $0x78] sm:$0xff]  ;;  %v40_v58 = vld [vmem:[%s2830_s1 + $0x70] sm:$0xff] }
  0x8e   :  { %922 = vmatpush1.msra.mxu1 %v204_v23  ;;  %852 = vmatprep.subr.mxu0 %v73_v24  ;;  %v169_v57 = vld [vmem:[%s2830_s1 + $0x478] sm:$0xff]  ;;  %v168_v59 = vld [vmem:[%s2830_s1 + $0x470] sm:$0xff] }
  0x8f   :  { %923 = vmatprep.subr.mxu1 %v201_v25  ;;  %853 = vmatpush1.msra.mxu0 %v72_v26  ;;  %v37_v60 = vld [vmem:[%s2830_s1 + $0x58] sm:$0xff]  ;;  %v36_v62 = vld [vmem:[%s2830_s1 + $0x50] sm:$0xff] }
  0x90   :  { %924 = vmatpush1.msra.mxu1 %v200_v27  ;;  %854 = vmatprep.subr.mxu0 %v69_v28  ;;  %v165_v61 = vld [vmem:[%s2830_s1 + $0x458] sm:$0xff]  ;;  %v164_v63 = vld [vmem:[%s2830_s1 + $0x450] sm:$0xff] }
  0x91   :  { %925 = vmatprep.subr.mxu1 %v197_v29  ;;  %855 = vmatpush1.msra.mxu0 %v68_v30  ;;  %v33_v0 = vld [vmem:[%s2830_s1 + $0x38] sm:$0xff]  ;;  %v32_v2 = vld [vmem:[%s2830_s1 + $0x30] sm:$0xff] }
  0x92   :  { %926 = vmatpush1.msra.mxu1 %v196_v31  ;;  %856 = vmatprep.subr.mxu0 %v65_v32  ;;  %v161_v1 = vld [vmem:[%s2830_s1 + $0x438] sm:$0xff]  ;;  %v160_v3 = vld [vmem:[%s2830_s1 + $0x430] sm:$0xff] }
  0x93   :  { %927 = vmatprep.subr.mxu1 %v193_v33  ;;  %857 = vmatpush1.msra.mxu0 %v64_v34  ;;  %v29_v4 = vld [vmem:[%s2830_s1 + $0x18] sm:$0xff]  ;;  %v28_v6 = vld [vmem:[%s2830_s1 + $0x10] sm:$0xff] }
  0x94   :  { %928 = vmatpush1.msra.mxu1 %v192_v35  ;;  %858 = vmatprep.subr.mxu0 %v61_v36  ;;  %v157_v5 = vld [vmem:[%s2830_s1 + $0x418] sm:$0xff]  ;;  %v156_v7 = vld [vmem:[%s2830_s1 + $0x410] sm:$0xff] }
  0x95   :  { %929 = vmatprep.subr.mxu1 %v189_v37  ;;  %859 = vmatpush1.msra.mxu0 %v60_v38  ;;  %v153_v8 = vld [vmem:[%s2830_s1 + $0x3f8] sm:$0xff]  ;;  %v152_v10 = vld [vmem:[%s2830_s1 + $0x3f0] sm:$0xff] }
  0x96   :  { %930 = vmatpush1.msra.mxu1 %v188_v39  ;;  %860 = vmatprep.subr.mxu0 %v57_v40  ;;  %v281_v9 = vld [vmem:[%s2830_s1 + $0x7f8] sm:$0xff]  ;;  %v280_v11 = vld [vmem:[%s2830_s1 + $0x7f0] sm:$0xff] }
  0x97   :  { %931 = vmatprep.subr.mxu1 %v185_v41  ;;  %861 = vmatpush1.msra.mxu0 %v56_v42  ;;  %v149_v12 = vld [vmem:[%s2830_s1 + $0x3d8] sm:$0xff]  ;;  %v148_v14 = vld [vmem:[%s2830_s1 + $0x3d0] sm:$0xff] }
  0x98   :  { %932 = vmatpush1.msra.mxu1 %v184_v43  ;;  %862 = vmatprep.subr.mxu0 %v53_v44  ;;  %v277_v13 = vld [vmem:[%s2830_s1 + $0x7d8] sm:$0xff]  ;;  %v276_v15 = vld [vmem:[%s2830_s1 + $0x7d0] sm:$0xff] }
  0x99   :  { %933 = vmatprep.subr.mxu1 %v181_v45  ;;  %863 = vmatpush1.msra.mxu0 %v52_v46  ;;  %v145_v16 = vld [vmem:[%s2830_s1 + $0x3b8] sm:$0xff]  ;;  %v144_v18 = vld [vmem:[%s2830_s1 + $0x3b0] sm:$0xff] }
  0x9a   :  { %934 = vmatpush1.msra.mxu1 %v180_v47  ;;  %864 = vmatprep.subr.mxu0 %v49_v48  ;;  %v273_v17 = vld [vmem:[%s2830_s1 + $0x7b8] sm:$0xff]  ;;  %v272_v19 = vld [vmem:[%s2830_s1 + $0x7b0] sm:$0xff] }
  0x9b   :  { %935 = vmatprep.subr.mxu1 %v177_v49  ;;  %865 = vmatpush1.msra.mxu0 %v48_v50  ;;  %v141_v20 = vld [vmem:[%s2830_s1 + $0x398] sm:$0xff]  ;;  %v140_v22 = vld [vmem:[%s2830_s1 + $0x390] sm:$0xff] }
  0x9c   :  { %936 = vmatpush1.msra.mxu1 %v176_v51  ;;  %866 = vmatprep.subr.mxu0 %v45_v52  ;;  %v269_v21 = vld [vmem:[%s2830_s1 + $0x798] sm:$0xff]  ;;  %v268_v23 = vld [vmem:[%s2830_s1 + $0x790] sm:$0xff] }
  0x9d   :  { %937 = vmatprep.subr.mxu1 %v173_v53  ;;  %867 = vmatpush1.msra.mxu0 %v44_v54  ;;  %v137_v24 = vld [vmem:[%s2830_s1 + $0x378] sm:$0xff]  ;;  %v136_v26 = vld [vmem:[%s2830_s1 + $0x370] sm:$0xff] }
  0x9e   :  { %938 = vmatpush1.msra.mxu1 %v172_v55  ;;  %868 = vmatprep.subr.mxu0 %v41_v56  ;;  %v265_v25 = vld [vmem:[%s2830_s1 + $0x778] sm:$0xff]  ;;  %v264_v27 = vld [vmem:[%s2830_s1 + $0x770] sm:$0xff] }
  0x9f   :  { %939 = vmatprep.subr.mxu1 %v169_v57  ;;  %869 = vmatpush1.msra.mxu0 %v40_v58  ;;  %v133_v28 = vld [vmem:[%s2830_s1 + $0x358] sm:$0xff]  ;;  %v132_v30 = vld [vmem:[%s2830_s1 + $0x350] sm:$0xff] }
  0xa0   :  { %940 = vmatpush1.msra.mxu1 %v168_v59  ;;  %870 = vmatprep.subr.mxu0 %v37_v60  ;;  %v261_v29 = vld [vmem:[%s2830_s1 + $0x758] sm:$0xff]  ;;  %v260_v31 = vld [vmem:[%s2830_s1 + $0x750] sm:$0xff] }
  0xa1   :  { %941 = vmatprep.subr.mxu1 %v165_v61  ;;  %871 = vmatpush1.msra.mxu0 %v36_v62  ;;  %v129_v32 = vld [vmem:[%s2830_s1 + $0x338] sm:$0xff]  ;;  %v128_v34 = vld [vmem:[%s2830_s1 + $0x330] sm:$0xff] }
  0xa2   :  { %942 = vmatpush1.msra.mxu1 %v164_v63  ;;  %872 = vmatprep.subr.mxu0 %v33_v0  ;;  %v257_v33 = vld [vmem:[%s2830_s1 + $0x738] sm:$0xff]  ;;  %v256_v35 = vld [vmem:[%s2830_s1 + $0x730] sm:$0xff] }
  0xa3   :  { %943 = vmatprep.subr.mxu1 %v161_v1  ;;  %873 = vmatpush1.msra.mxu0 %v32_v2  ;;  %v125_v36 = vld [vmem:[%s2830_s1 + $0x318] sm:$0xff]  ;;  %v124_v38 = vld [vmem:[%s2830_s1 + $0x310] sm:$0xff] }
  0xa4   :  { %944 = vmatpush1.msra.mxu1 %v160_v3  ;;  %874 = vmatprep.subr.mxu0 %v29_v4  ;;  %v253_v37 = vld [vmem:[%s2830_s1 + $0x718] sm:$0xff]  ;;  %v252_v39 = vld [vmem:[%s2830_s1 + $0x710] sm:$0xff] }
  0xa5   :  { %945 = vmatprep.subr.mxu1 %v157_v5  ;;  %875 = vmatpush1.msra.mxu0 %v28_v6  ;;  %v121_v40 = vld [vmem:[%s2830_s1 + $0x2f8] sm:$0xff]  ;;  %v120_v42 = vld [vmem:[%s2830_s1 + $0x2f0] sm:$0xff] }
  0xa6   :  { %946 = vmatpush1.msra.mxu1 %v156_v7  ;;  %876 = vmatprep.subr.mxu0 %v153_v8  ;;  %v249_v41 = vld [vmem:[%s2830_s1 + $0x6f8] sm:$0xff]  ;;  %v248_v43 = vld [vmem:[%s2830_s1 + $0x6f0] sm:$0xff] }
  0xa7   :  { %947 = vmatprep.subr.mxu1 %v281_v9  ;;  %877 = vmatpush2.msra.mxu0 %v152_v10  ;;  %v117_v44 = vld [vmem:[%s2830_s1 + $0x2d8] sm:$0xff]  ;;  %v116_v46 = vld [vmem:[%s2830_s1 + $0x2d0] sm:$0xff]  ;;  %v1192_v9 = vld [vmem:[%s2831_s0 + $0x8] sm:$0xff] }
  0xa8   :  { %948 = vmatpush2.msra.mxu1 %v280_v11  ;;  %878 = vmatprep.subr.mxu0 %v149_v12  ;;  %v245_v45 = vld [vmem:[%s2830_s1 + $0x6d8] sm:$0xff]  ;;  %v244_v47 = vld [vmem:[%s2830_s1 + $0x6d0] sm:$0xff]  ;;  %v1193_v11 = vld [vmem:[%s2831_s0] sm:$0xff] }
  0xa9   :  { %949 = vmatprep.subr.mxu1 %v277_v13  ;;  %879 = vmatpush2.msra.mxu0 %v148_v14  ;;  %v113_v48 = vld [vmem:[%s2830_s1 + $0x2b8] sm:$0xff]  ;;  %v112_v50 = vld [vmem:[%s2830_s1 + $0x2b0] sm:$0xff] }
  0xaa   :  { %950 = vmatpush2.msra.mxu1 %v276_v15  ;;  %880 = vmatprep.subr.mxu0 %v145_v16  ;;  %v241_v49 = vld [vmem:[%s2830_s1 + $0x6b8] sm:$0xff]  ;;  %v240_v51 = vld [vmem:[%s2830_s1 + $0x6b0] sm:$0xff] }
  0xab   :  { %951 = vmatprep.subr.mxu1 %v273_v17  ;;  %881 = vmatpush2.msra.mxu0 %v144_v18  ;;  %v109_v52 = vld [vmem:[%s2830_s1 + $0x298] sm:$0xff]  ;;  %v108_v54 = vld [vmem:[%s2830_s1 + $0x290] sm:$0xff] }
  0xac   :  { %952 = vmatpush2.msra.mxu1 %v272_v19  ;;  %882 = vmatprep.subr.mxu0 %v141_v20  ;;  %v237_v53 = vld [vmem:[%s2830_s1 + $0x698] sm:$0xff]  ;;  %v236_v55 = vld [vmem:[%s2830_s1 + $0x690] sm:$0xff] }
  0xad   :  { %953 = vmatprep.subr.mxu1 %v269_v21  ;;  %883 = vmatpush2.msra.mxu0 %v140_v22  ;;  %v105_v56 = vld [vmem:[%s2830_s1 + $0x278] sm:$0xff]  ;;  %v104_v58 = vld [vmem:[%s2830_s1 + $0x270] sm:$0xff] }
  0xae   :  { %954 = vmatpush2.msra.mxu1 %v268_v23  ;;  %884 = vmatprep.subr.mxu0 %v137_v24  ;;  %v233_v57 = vld [vmem:[%s2830_s1 + $0x678] sm:$0xff]  ;;  %v232_v59 = vld [vmem:[%s2830_s1 + $0x670] sm:$0xff] }
  0xaf   :  { %955 = vmatprep.subr.mxu1 %v265_v25  ;;  %885 = vmatpush2.msra.mxu0 %v136_v26  ;;  %v101_v60 = vld [vmem:[%s2830_s1 + $0x258] sm:$0xff]  ;;  %v100_v62 = vld [vmem:[%s2830_s1 + $0x250] sm:$0xff] }
  0xb0   :  { %956 = vmatpush2.msra.mxu1 %v264_v27  ;;  %886 = vmatprep.subr.mxu0 %v133_v28  ;;  %v229_v61 = vld [vmem:[%s2830_s1 + $0x658] sm:$0xff]  ;;  %v228_v63 = vld [vmem:[%s2830_s1 + $0x650] sm:$0xff] }
  0xb1   :  { %957 = vmatprep.subr.mxu1 %v261_v29  ;;  %887 = vmatpush2.msra.mxu0 %v132_v30  ;;  %v97_v0 = vld [vmem:[%s2830_s1 + $0x238] sm:$0xff]  ;;  %v96_v2 = vld [vmem:[%s2830_s1 + $0x230] sm:$0xff] }
  0xb2   :  { %958 = vmatpush2.msra.mxu1 %v260_v31  ;;  %888 = vmatprep.subr.mxu0 %v129_v32  ;;  %v225_v1 = vld [vmem:[%s2830_s1 + $0x638] sm:$0xff]  ;;  %v224_v3 = vld [vmem:[%s2830_s1 + $0x630] sm:$0xff] }
  0xb3   :  { %959 = vmatprep.subr.mxu1 %v257_v33  ;;  %889 = vmatpush2.msra.mxu0 %v128_v34  ;;  %v93_v4 = vld [vmem:[%s2830_s1 + $0x218] sm:$0xff]  ;;  %v92_v6 = vld [vmem:[%s2830_s1 + $0x210] sm:$0xff] }
  0xb4   :  { %960 = vmatpush2.msra.mxu1 %v256_v35  ;;  %890 = vmatprep.subr.mxu0 %v125_v36  ;;  %v221_v5 = vld [vmem:[%s2830_s1 + $0x618] sm:$0xff]  ;;  %v220_v7 = vld [vmem:[%s2830_s1 + $0x610] sm:$0xff] }
  0xb5   :  { %961 = vmatprep.subr.mxu1 %v253_v37  ;;  %891 = vmatpush2.msra.mxu0 %v124_v38  ;;  %v345_v8 = vld [vmem:[%s2830_s1 + $0x9f8] sm:$0xff]  ;;  %v344_v12 = vld [vmem:[%s2830_s1 + $0x9f0] sm:$0xff] }
  0xb6   :  { %962 = vmatpush2.msra.mxu1 %v252_v39  ;;  %892 = vmatprep.subr.mxu0 %v121_v40  ;;  %v473_v10 = vld [vmem:[%s2830_s1 + $0xdf8] sm:$0xff]  ;;  %v472_v13 = vld [vmem:[%s2830_s1 + $0xdf0] sm:$0xff] }
  0xb7   :  { %963 = vmatprep.subr.mxu1 %v249_v41  ;;  %893 = vmatpush2.msra.mxu0 %v120_v42  ;;  %v1194_v14 = vld [vmem:[%s2831_s0 + $0x18] sm:$0xff]  ;;  %v1195_v17 = vld [vmem:[%s2831_s0 + $0x10] sm:$0xff] }
  0xb8   :  { %964 = vmatpush2.msra.mxu1 %v248_v43  ;;  %894 = vmatprep.subr.mxu0 %v117_v44  ;;  %v341_v15 = vld [vmem:[%s2830_s1 + $0x9d8] sm:$0xff]  ;;  %v340_v18 = vld [vmem:[%s2830_s1 + $0x9d0] sm:$0xff] }
  0xb9   :  { %965 = vmatprep.subr.mxu1 %v245_v45  ;;  %895 = vmatpush2.msra.mxu0 %v116_v46  ;;  %v469_v16 = vld [vmem:[%s2830_s1 + $0xdd8] sm:$0xff]  ;;  %v468_v19 = vld [vmem:[%s2830_s1 + $0xdd0] sm:$0xff] }
  0xba   :  { %966 = vmatpush2.msra.mxu1 %v244_v47  ;;  %896 = vmatprep.subr.mxu0 %v113_v48  ;;  %v337_v20 = vld [vmem:[%s2830_s1 + $0x9b8] sm:$0xff]  ;;  %v336_v22 = vld [vmem:[%s2830_s1 + $0x9b0] sm:$0xff] }
  0xbb   :  { %967 = vmatprep.subr.mxu1 %v241_v49  ;;  %897 = vmatpush2.msra.mxu0 %v112_v50  ;;  %v465_v21 = vld [vmem:[%s2830_s1 + $0xdb8] sm:$0xff]  ;;  %v464_v23 = vld [vmem:[%s2830_s1 + $0xdb0] sm:$0xff] }
  0xbc   :  { %968 = vmatpush2.msra.mxu1 %v240_v51  ;;  %898 = vmatprep.subr.mxu0 %v109_v52  ;;  %v333_v24 = vld [vmem:[%s2830_s1 + $0x998] sm:$0xff]  ;;  %v332_v26 = vld [vmem:[%s2830_s1 + $0x990] sm:$0xff] }
  0xbd   :  { %969 = vmatprep.subr.mxu1 %v237_v53  ;;  %899 = vmatpush2.msra.mxu0 %v108_v54  ;;  %v461_v25 = vld [vmem:[%s2830_s1 + $0xd98] sm:$0xff]  ;;  %v460_v27 = vld [vmem:[%s2830_s1 + $0xd90] sm:$0xff] }
  0xbe   :  { %970 = vmatpush2.msra.mxu1 %v236_v55  ;;  %900 = vmatprep.subr.mxu0 %v105_v56  ;;  %v329_v28 = vld [vmem:[%s2830_s1 + $0x978] sm:$0xff]  ;;  %v328_v30 = vld [vmem:[%s2830_s1 + $0x970] sm:$0xff] }
  0xbf   :  { %971 = vmatprep.subr.mxu1 %v233_v57  ;;  %901 = vmatpush2.msra.mxu0 %v104_v58  ;;  %v457_v29 = vld [vmem:[%s2830_s1 + $0xd78] sm:$0xff]  ;;  %v456_v31 = vld [vmem:[%s2830_s1 + $0xd70] sm:$0xff] }
  0xc0   :  { %972 = vmatpush2.msra.mxu1 %v232_v59  ;;  %902 = vmatprep.subr.mxu0 %v101_v60  ;;  %v325_v32 = vld [vmem:[%s2830_s1 + $0x958] sm:$0xff]  ;;  %v324_v34 = vld [vmem:[%s2830_s1 + $0x950] sm:$0xff] }
  0xc1   :  { %973 = vmatprep.subr.mxu1 %v229_v61  ;;  %903 = vmatpush2.msra.mxu0 %v100_v62  ;;  %v453_v33 = vld [vmem:[%s2830_s1 + $0xd58] sm:$0xff]  ;;  %v452_v35 = vld [vmem:[%s2830_s1 + $0xd50] sm:$0xff] }
  0xc2   :  { %974 = vmatpush2.msra.mxu1 %v228_v63  ;;  %904 = vmatprep.subr.mxu0 %v97_v0  ;;  %v321_v36 = vld [vmem:[%s2830_s1 + $0x938] sm:$0xff]  ;;  %v320_v38 = vld [vmem:[%s2830_s1 + $0x930] sm:$0xff] }
  0xc3   :  { %975 = vmatprep.subr.mxu1 %v225_v1  ;;  %905 = vmatpush2.msra.mxu0 %v96_v2  ;;  %v449_v37 = vld [vmem:[%s2830_s1 + $0xd38] sm:$0xff]  ;;  %v448_v39 = vld [vmem:[%s2830_s1 + $0xd30] sm:$0xff] }
  0xc4   :  { %976 = vmatpush2.msra.mxu1 %v224_v3  ;;  %906 = vmatprep.subr.mxu0 %v93_v4  ;;  %v317_v40 = vld [vmem:[%s2830_s1 + $0x918] sm:$0xff]  ;;  %v316_v42 = vld [vmem:[%s2830_s1 + $0x910] sm:$0xff] }
  0xc5   :  { %977 = vmatprep.subr.mxu1 %v221_v5  ;;  %907 = vmatpush2.msra.mxu0 %v92_v6  ;;  %v445_v41 = vld [vmem:[%s2830_s1 + $0xd18] sm:$0xff]  ;;  %v444_v43 = vld [vmem:[%s2830_s1 + $0xd10] sm:$0xff] }
  0xc6   :  { %908 = vmatprep.mubr.f32.mxu0 %v1192_v9  ;;  %978 = vmatpush2.msra.mxu1 %v220_v7  ;;  %v313_v44 = vld [vmem:[%s2830_s1 + $0x8f8] sm:$0xff]  ;;  %v312_v46 = vld [vmem:[%s2830_s1 + $0x8f0] sm:$0xff] }
  0xc7   :  { %909 = vmatmul.mubr.f32.vlgmr.msra.gmra.mxu0 %v1193_v11  ;;  %979 = vmatprep.mubr.f32.mxu1 %v1194_v14  ;;  %v441_v45 = vld [vmem:[%s2830_s1 + $0xcf8] sm:$0xff]  ;;  %v440_v47 = vld [vmem:[%s2830_s1 + $0xcf0] sm:$0xff] }
  0xc8   :  { %986 = vmatprep.subr.mxu0 %v345_v8  ;;  %1057 = vmatprep.subr.mxu1 %v473_v10  ;;  %v309_v48 = vld [vmem:[%s2830_s1 + $0x8d8] sm:$0xff]  ;;  %v308_v50 = vld [vmem:[%s2830_s1 + $0x8d0] sm:$0xff] }
  0xc9   :  { %980 = vmatmul.mubr.f32.vlgmr.msra.gmra.mxu1 %v1195_v17  ;;  %987 = vmatpush1.msra.mxu0 %v344_v12  ;;  %v437_v49 = vld [vmem:[%s2830_s1 + $0xcd8] sm:$0xff]  ;;  %v436_v51 = vld [vmem:[%s2830_s1 + $0xcd0] sm:$0xff] }
  0xca   :  { %1058 = vmatpush1.msra.mxu1 %v472_v13  ;;  %988 = vmatprep.subr.mxu0 %v341_v15  ;;  %v305_v52 = vld [vmem:[%s2830_s1 + $0x8b8] sm:$0xff]  ;;  %v304_v54 = vld [vmem:[%s2830_s1 + $0x8b0] sm:$0xff] }
  0xcb   :  { %1059 = vmatprep.subr.mxu1 %v469_v16  ;;  %989 = vmatpush1.msra.mxu0 %v340_v18  ;;  %v433_v53 = vld [vmem:[%s2830_s1 + $0xcb8] sm:$0xff]  ;;  %v432_v55 = vld [vmem:[%s2830_s1 + $0xcb0] sm:$0xff] }
  0xcc   :  { %1060 = vmatpush1.msra.mxu1 %v468_v19  ;;  %990 = vmatprep.subr.mxu0 %v337_v20  ;;  %v301_v56 = vld [vmem:[%s2830_s1 + $0x898] sm:$0xff]  ;;  %v300_v58 = vld [vmem:[%s2830_s1 + $0x890] sm:$0xff] }
  0xcd   :  { %1061 = vmatprep.subr.mxu1 %v465_v21  ;;  %991 = vmatpush1.msra.mxu0 %v336_v22  ;;  %v429_v57 = vld [vmem:[%s2830_s1 + $0xc98] sm:$0xff]  ;;  %v428_v59 = vld [vmem:[%s2830_s1 + $0xc90] sm:$0xff] }
  0xce   :  { %1062 = vmatpush1.msra.mxu1 %v464_v23  ;;  %992 = vmatprep.subr.mxu0 %v333_v24  ;;  %v297_v60 = vld [vmem:[%s2830_s1 + $0x878] sm:$0xff]  ;;  %v296_v62 = vld [vmem:[%s2830_s1 + $0x870] sm:$0xff] }
  0xcf   :  { %1063 = vmatprep.subr.mxu1 %v461_v25  ;;  %993 = vmatpush1.msra.mxu0 %v332_v26  ;;  %v425_v61 = vld [vmem:[%s2830_s1 + $0xc78] sm:$0xff]  ;;  %v424_v63 = vld [vmem:[%s2830_s1 + $0xc70] sm:$0xff] }
  0xd0   :  { %1064 = vmatpush1.msra.mxu1 %v460_v27  ;;  %994 = vmatprep.subr.mxu0 %v329_v28  ;;  %v293_v0 = vld [vmem:[%s2830_s1 + $0x858] sm:$0xff]  ;;  %v292_v2 = vld [vmem:[%s2830_s1 + $0x850] sm:$0xff] }
  0xd1   :  { %1065 = vmatprep.subr.mxu1 %v457_v29  ;;  %995 = vmatpush1.msra.mxu0 %v328_v30  ;;  %v421_v1 = vld [vmem:[%s2830_s1 + $0xc58] sm:$0xff]  ;;  %v420_v3 = vld [vmem:[%s2830_s1 + $0xc50] sm:$0xff] }
  0xd2   :  { %1066 = vmatpush1.msra.mxu1 %v456_v31  ;;  %996 = vmatprep.subr.mxu0 %v325_v32  ;;  %v289_v4 = vld [vmem:[%s2830_s1 + $0x838] sm:$0xff]  ;;  %v288_v6 = vld [vmem:[%s2830_s1 + $0x830] sm:$0xff] }
  0xd3   :  { %1067 = vmatprep.subr.mxu1 %v453_v33  ;;  %997 = vmatpush1.msra.mxu0 %v324_v34  ;;  %v417_v5 = vld [vmem:[%s2830_s1 + $0xc38] sm:$0xff]  ;;  %v416_v7 = vld [vmem:[%s2830_s1 + $0xc30] sm:$0xff] }
  0xd4   :  { %1068 = vmatpush1.msra.mxu1 %v452_v35  ;;  %998 = vmatprep.subr.mxu0 %v321_v36  ;;  %v285_v8 = vld [vmem:[%s2830_s1 + $0x818] sm:$0xff]  ;;  %v284_v10 = vld [vmem:[%s2830_s1 + $0x810] sm:$0xff] }
  0xd5   :  { %1069 = vmatprep.subr.mxu1 %v449_v37  ;;  %999 = vmatpush1.msra.mxu0 %v320_v38  ;;  %v413_v9 = vld [vmem:[%s2830_s1 + $0xc18] sm:$0xff]  ;;  %v412_v11 = vld [vmem:[%s2830_s1 + $0xc10] sm:$0xff] }
  0xd6   :  { %1070 = vmatpush1.msra.mxu1 %v448_v39  ;;  %1000 = vmatprep.subr.mxu0 %v317_v40  ;;  %v409_v12 = vld [vmem:[%s2830_s1 + $0xbf8] sm:$0xff]  ;;  %v408_v14 = vld [vmem:[%s2830_s1 + $0xbf0] sm:$0xff] }
  0xd7   :  { %1071 = vmatprep.subr.mxu1 %v445_v41  ;;  %1001 = vmatpush1.msra.mxu0 %v316_v42  ;;  %v537_v13 = vld [vmem:[%s2830_s1 + $0xff8] sm:$0xff]  ;;  %v536_v15 = vld [vmem:[%s2830_s1 + $0xff0] sm:$0xff] }
  0xd8   :  { %1072 = vmatpush1.msra.mxu1 %v444_v43  ;;  %1002 = vmatprep.subr.mxu0 %v313_v44  ;;  %v405_v16 = vld [vmem:[%s2830_s1 + $0xbd8] sm:$0xff]  ;;  %v404_v18 = vld [vmem:[%s2830_s1 + $0xbd0] sm:$0xff] }
  0xd9   :  { %1073 = vmatprep.subr.mxu1 %v441_v45  ;;  %1003 = vmatpush1.msra.mxu0 %v312_v46  ;;  %v533_v17 = vld [vmem:[%s2830_s1 + $0xfd8] sm:$0xff]  ;;  %v532_v19 = vld [vmem:[%s2830_s1 + $0xfd0] sm:$0xff] }
  0xda   :  { %1074 = vmatpush1.msra.mxu1 %v440_v47  ;;  %1004 = vmatprep.subr.mxu0 %v309_v48  ;;  %v401_v20 = vld [vmem:[%s2830_s1 + $0xbb8] sm:$0xff]  ;;  %v400_v22 = vld [vmem:[%s2830_s1 + $0xbb0] sm:$0xff] }
  0xdb   :  { %1075 = vmatprep.subr.mxu1 %v437_v49  ;;  %1005 = vmatpush1.msra.mxu0 %v308_v50  ;;  %v529_v21 = vld [vmem:[%s2830_s1 + $0xfb8] sm:$0xff]  ;;  %v528_v23 = vld [vmem:[%s2830_s1 + $0xfb0] sm:$0xff] }
  0xdc   :  { %1076 = vmatpush1.msra.mxu1 %v436_v51  ;;  %1006 = vmatprep.subr.mxu0 %v305_v52  ;;  %v397_v24 = vld [vmem:[%s2830_s1 + $0xb98] sm:$0xff]  ;;  %v396_v26 = vld [vmem:[%s2830_s1 + $0xb90] sm:$0xff] }
  0xdd   :  { %1077 = vmatprep.subr.mxu1 %v433_v53  ;;  %1007 = vmatpush1.msra.mxu0 %v304_v54  ;;  %v525_v25 = vld [vmem:[%s2830_s1 + $0xf98] sm:$0xff]  ;;  %v524_v27 = vld [vmem:[%s2830_s1 + $0xf90] sm:$0xff] }
  0xde   :  { %1078 = vmatpush1.msra.mxu1 %v432_v55  ;;  %1008 = vmatprep.subr.mxu0 %v301_v56  ;;  %v393_v28 = vld [vmem:[%s2830_s1 + $0xb78] sm:$0xff]  ;;  %v392_v30 = vld [vmem:[%s2830_s1 + $0xb70] sm:$0xff] }
  0xdf   :  { %1079 = vmatprep.subr.mxu1 %v429_v57  ;;  %1009 = vmatpush1.msra.mxu0 %v300_v58  ;;  %v521_v29 = vld [vmem:[%s2830_s1 + $0xf78] sm:$0xff]  ;;  %v520_v31 = vld [vmem:[%s2830_s1 + $0xf70] sm:$0xff] }
  0xe0   :  { %1080 = vmatpush1.msra.mxu1 %v428_v59  ;;  %1010 = vmatprep.subr.mxu0 %v297_v60  ;;  %v389_v32 = vld [vmem:[%s2830_s1 + $0xb58] sm:$0xff]  ;;  %v388_v34 = vld [vmem:[%s2830_s1 + $0xb50] sm:$0xff] }
  0xe1   :  { %1081 = vmatprep.subr.mxu1 %v425_v61  ;;  %1011 = vmatpush1.msra.mxu0 %v296_v62  ;;  %v517_v33 = vld [vmem:[%s2830_s1 + $0xf58] sm:$0xff]  ;;  %v516_v35 = vld [vmem:[%s2830_s1 + $0xf50] sm:$0xff] }
  0xe2   :  { %1082 = vmatpush1.msra.mxu1 %v424_v63  ;;  %1012 = vmatprep.subr.mxu0 %v293_v0  ;;  %v385_v36 = vld [vmem:[%s2830_s1 + $0xb38] sm:$0xff]  ;;  %v384_v38 = vld [vmem:[%s2830_s1 + $0xb30] sm:$0xff] }
  0xe3   :  { %1083 = vmatprep.subr.mxu1 %v421_v1  ;;  %1013 = vmatpush1.msra.mxu0 %v292_v2  ;;  %v513_v37 = vld [vmem:[%s2830_s1 + $0xf38] sm:$0xff]  ;;  %v512_v39 = vld [vmem:[%s2830_s1 + $0xf30] sm:$0xff] }
  0xe4   :  { %1084 = vmatpush1.msra.mxu1 %v420_v3  ;;  %1014 = vmatprep.subr.mxu0 %v289_v4  ;;  %v381_v40 = vld [vmem:[%s2830_s1 + $0xb18] sm:$0xff]  ;;  %v380_v42 = vld [vmem:[%s2830_s1 + $0xb10] sm:$0xff] }
  0xe5   :  { %1085 = vmatprep.subr.mxu1 %v417_v5  ;;  %1015 = vmatpush1.msra.mxu0 %v288_v6  ;;  %v509_v41 = vld [vmem:[%s2830_s1 + $0xf18] sm:$0xff]  ;;  %v508_v43 = vld [vmem:[%s2830_s1 + $0xf10] sm:$0xff] }
  0xe6   :  { %1086 = vmatpush1.msra.mxu1 %v416_v7  ;;  %1016 = vmatprep.subr.mxu0 %v285_v8  ;;  %v377_v44 = vld [vmem:[%s2830_s1 + $0xaf8] sm:$0xff]  ;;  %v376_v46 = vld [vmem:[%s2830_s1 + $0xaf0] sm:$0xff] }
  0xe7   :  { %1087 = vmatprep.subr.mxu1 %v413_v9  ;;  %1017 = vmatpush1.msra.mxu0 %v284_v10  ;;  %v505_v45 = vld [vmem:[%s2830_s1 + $0xef8] sm:$0xff]  ;;  %v504_v47 = vld [vmem:[%s2830_s1 + $0xef0] sm:$0xff] }
  0xe8   :  { %1088 = vmatpush1.msra.mxu1 %v412_v11  ;;  %1018 = vmatprep.subr.mxu0 %v409_v12  ;;  %v373_v48 = vld [vmem:[%s2830_s1 + $0xad8] sm:$0xff]  ;;  %v372_v50 = vld [vmem:[%s2830_s1 + $0xad0] sm:$0xff]  ;;  %v1196_v12 = vld [vmem:[%s2831_s0 + $0x28] sm:$0xff] }
  0xe9   :  { %1089 = vmatprep.subr.mxu1 %v537_v13  ;;  %1019 = vmatpush2.msra.mxu0 %v408_v14  ;;  %v501_v49 = vld [vmem:[%s2830_s1 + $0xed8] sm:$0xff]  ;;  %v500_v51 = vld [vmem:[%s2830_s1 + $0xed0] sm:$0xff]  ;;  %v1198_v14 = vld [vmem:[%s2831_s0 + $0x20] sm:$0xff] }
  0xea   :  { %1090 = vmatpush2.msra.mxu1 %v536_v15  ;;  %1020 = vmatprep.subr.mxu0 %v405_v16  ;;  %v369_v52 = vld [vmem:[%s2830_s1 + $0xab8] sm:$0xff]  ;;  %v368_v54 = vld [vmem:[%s2830_s1 + $0xab0] sm:$0xff]  ;;  %v540_v16 = vlaneseq }
  0xeb   :  { %1091 = vmatprep.subr.mxu1 %v533_v17  ;;  %1021 = vmatpush2.msra.mxu0 %v404_v18  ;;  %v497_v53 = vld [vmem:[%s2830_s1 + $0xeb8] sm:$0xff]  ;;  %v496_v55 = vld [vmem:[%s2830_s1 + $0xeb0] sm:$0xff] }
  0xec   :  { %1092 = vmatpush2.msra.mxu1 %v532_v19  ;;  %1022 = vmatprep.subr.mxu0 %v401_v20  ;;  %v365_v56 = vld [vmem:[%s2830_s1 + $0xa98] sm:$0xff]  ;;  %v364_v58 = vld [vmem:[%s2830_s1 + $0xa90] sm:$0xff]  ;;  %v2810_v17 = vshrl.u32 %v540_v16, 7 }
  0xed   :  { %1093 = vmatprep.subr.mxu1 %v529_v21  ;;  %1023 = vmatpush2.msra.mxu0 %v400_v22  ;;  %v493_v57 = vld [vmem:[%s2830_s1 + $0xe98] sm:$0xff]  ;;  %v492_v59 = vld [vmem:[%s2830_s1 + $0xe90] sm:$0xff] }
  0xee   :  { %1094 = vmatpush2.msra.mxu1 %v528_v23  ;;  %1024 = vmatprep.subr.mxu0 %v397_v24  ;;  %v361_v60 = vld [vmem:[%s2830_s1 + $0xa78] sm:$0xff]  ;;  %v360_v62 = vld [vmem:[%s2830_s1 + $0xa70] sm:$0xff]  ;;  %v546_v18 = vsub.s32 1, %v2810_v17  ;;  %v542_v21 = vsub.s32 0, %v2810_v17 }
  0xef   :  { %1095 = vmatprep.subr.mxu1 %v525_v25  ;;  %1025 = vmatpush2.msra.mxu0 %v396_v26  ;;  %v489_v61 = vld [vmem:[%s2830_s1 + $0xe78] sm:$0xff]  ;;  %v488_v63 = vld [vmem:[%s2830_s1 + $0xe70] sm:$0xff] }
  0xf0   :  { %1096 = vmatpush2.msra.mxu1 %v524_v27  ;;  %1026 = vmatprep.subr.mxu0 %v393_v28  ;;  %v357_v0 = vld [vmem:[%s2830_s1 + $0xa58] sm:$0xff]  ;;  %v356_v2 = vld [vmem:[%s2830_s1 + $0xa50] sm:$0xff] }
  0xf1   :  { %1097 = vmatprep.subr.mxu1 %v521_v29  ;;  %1027 = vmatpush2.msra.mxu0 %v392_v30  ;;  %v485_v1 = vld [vmem:[%s2830_s1 + $0xe58] sm:$0xff]  ;;  %v484_v3 = vld [vmem:[%s2830_s1 + $0xe50] sm:$0xff]  ;;  %v550_v30 = vsub.s32 2, %v2810_v17 }
  0xf2   :  { %1098 = vmatpush2.msra.mxu1 %v520_v31  ;;  %1028 = vmatprep.subr.mxu0 %v389_v32  ;;  %v353_v4 = vld [vmem:[%s2830_s1 + $0xa38] sm:$0xff]  ;;  %v352_v6 = vld [vmem:[%s2830_s1 + $0xa30] sm:$0xff] }
  0xf3   :  { %1099 = vmatprep.subr.mxu1 %v517_v33  ;;  %1029 = vmatpush2.msra.mxu0 %v388_v34  ;;  %v481_v5 = vld [vmem:[%s2830_s1 + $0xe38] sm:$0xff]  ;;  %v480_v7 = vld [vmem:[%s2830_s1 + $0xe30] sm:$0xff]  ;;  %v554_v34 = vsub.s32 3, %v2810_v17 }
  0xf4   :  { %1100 = vmatpush2.msra.mxu1 %v516_v35  ;;  %1030 = vmatprep.subr.mxu0 %v385_v36  ;;  %v349_v8 = vld [vmem:[%s2830_s1 + $0xa18] sm:$0xff]  ;;  %v348_v10 = vld [vmem:[%s2830_s1 + $0xa10] sm:$0xff] }
  0xf5   :  { %1101 = vmatprep.subr.mxu1 %v513_v37  ;;  %1031 = vmatpush2.msra.mxu0 %v384_v38  ;;  %v477_v9 = vld [vmem:[%s2830_s1 + $0xe18] sm:$0xff]  ;;  %v476_v11 = vld [vmem:[%s2830_s1 + $0xe10] sm:$0xff] }
  0xf6   :  { %1102 = vmatpush2.msra.mxu1 %v512_v39  ;;  %1032 = vmatprep.subr.mxu0 %v381_v40  ;;  %v1197_v13 = vld [vmem:[%s2831_s0 + $0x38] sm:$0xff]  ;;  %v1199_v15 = vld [vmem:[%s2831_s0 + $0x30] sm:$0xff] }
  0xf7   :  { %1103 = vmatprep.subr.mxu1 %v509_v41  ;;  %1033 = vmatpush2.msra.mxu0 %v380_v42  ;;  %v538_v19 = vld [vmem:[%s2832_s2] ss:$8 sm:$0xf] }
  0xf8   :  { %1104 = vmatpush2.msra.mxu1 %v508_v43  ;;  %1034 = vmatprep.subr.mxu0 %v377_v44  ;;  %v547_v22 = vrot.slane %v538_v19, %v546_v18  ;;  %v543_v25 = vrot.slane %v538_v19, %v542_v21  ;;  %v551_v38 = vrot.slane %v538_v19, %v550_v30 }
  0xf9   :  { %1105 = vmatprep.subr.mxu1 %v505_v45  ;;  %1035 = vmatpush2.msra.mxu0 %v376_v46  ;;  %v555_v41 = vrot.slane %v538_v19, %v554_v34 }
  0xfa   :  { %1106 = vmatpush2.msra.mxu1 %v504_v47  ;;  %1036 = vmatprep.subr.mxu0 %v373_v48  ;;  %v1187_v48 = vld [vmem:[%s2832_s2 + $0x1] ss:$8 sm:$0xf] }
  0xfb   :  { %1107 = vmatprep.subr.mxu1 %v501_v49  ;;  %1037 = vmatpush2.msra.mxu0 %v372_v50 }
  0xfc   :  { %1108 = vmatpush2.msra.mxu1 %v500_v51  ;;  %1038 = vmatprep.subr.mxu0 %v369_v52  ;;  %v1142_v51 = vrot.slane %v1187_v48, %v546_v18 }
  0xfd   :  { %1109 = vmatprep.subr.mxu1 %v497_v53  ;;  %1039 = vmatpush2.msra.mxu0 %v368_v54 }
  0xfe   :  { %1110 = vmatpush2.msra.mxu1 %v496_v55  ;;  %1040 = vmatprep.subr.mxu0 %v365_v56  ;;  %v1138_v56 = vrot.slane %v1187_v48, %v542_v21 }
  0xff   :  { %1111 = vmatprep.subr.mxu1 %v493_v57  ;;  %1041 = vmatpush2.msra.mxu0 %v364_v58 }
 0x100   :  { %1112 = vmatpush2.msra.mxu1 %v492_v59  ;;  %1042 = vmatprep.subr.mxu0 %v361_v60 }
 0x101   :  { %1113 = vmatprep.subr.mxu1 %v489_v61  ;;  %1043 = vmatpush2.msra.mxu0 %v360_v62  ;;  %v1146_v62 = vrot.slane %v1187_v48, %v550_v30 }
 0x102   :  { %1114 = vmatpush2.msra.mxu1 %v488_v63  ;;  %1044 = vmatprep.subr.mxu0 %v357_v0 }
 0x103   :  { %1115 = vmatprep.subr.mxu1 %v485_v1  ;;  %1045 = vmatpush2.msra.mxu0 %v356_v2  ;;  %v626_v20 = vpop.f32.mrf.mxu0 }
 0x104   :  { %1116 = vmatpush2.msra.mxu1 %v484_v3  ;;  %1046 = vmatprep.subr.mxu0 %v353_v4  ;;  %v627_v29 = vadd.f32 %v626_v20, %v543_v25  ;;  %v1150_v4 = vrot.slane %v1187_v48, %v554_v34  ;;  %v1175_v20 = vand.u32 127, %v540_v16 }
 0x105   :  { %1117 = vmatprep.subr.mxu1 %v481_v5  ;;  %1047 = vmatpush2.msra.mxu0 %v352_v6  ;;  %v697_v23 = vpop.f32.mrf.mxu1  ;;  %v628_v24 = vpop.f32.mrf.mxu0 }
 0x106   :  { %1118 = vmatpush2.msra.mxu1 %v480_v7  ;;  %1048 = vmatprep.subr.mxu0 %v349_v8  ;;  %v629_v27 = vadd.f32 %v628_v24, %v547_v22  ;;  %v698_v36 = vadd.f32 %v697_v23, %v627_v29  ;;  %v1178_v21 = vsub.s32 %v1175_v20, %v2810_v17 }
 0x107   :  { %1119 = vmatprep.subr.mxu1 %v477_v9  ;;  %1049 = vmatpush2.msra.mxu0 %v348_v10  ;;  %v699_v28 = vpop.f32.mrf.mxu1 }
 0x108   :  { %1050 = vmatprep.mubr.f32.mxu0 %v1196_v12  ;;  %1120 = vmatpush2.msra.mxu1 %v476_v11  ;;  %v700_v33 = vadd.f32 %v699_v28, %v629_v27  ;;  %v1165_v11 = vstv %s2833_s3 }
 0x109   :  { %1121 = vmatprep.mubr.f32.mxu1 %v1197_v13  ;;  %1051 = vmatmul.mubr.f32.vlgmr.msra.gmra.mxu0 %v1198_v14 }
 0x10a   :  { %1122 = vmatmul.mubr.f32.vlgmr.msra.gmra.mxu1 %v1199_v15 }
 0x145   :  { %v768_v26 = vpop.f32.mrf.mxu0 }
 0x146   :  { %v769_v40 = vadd.f32 %v768_v26, %v698_v36 }
 0x147   :  { %v839_v31 = vpop.f32.mrf.mxu1  ;;  %v770_v32 = vpop.f32.mrf.mxu0 }
 0x148   :  { %v771_v37 = vadd.f32 %v770_v32, %v700_v33  ;;  %v840_v46 = vadd.f32 %v839_v31, %v769_v40 }
 0x149   :  { %v841_v39 = vpop.f32.mrf.mxu1 }
 0x14a   :  { %v842_v44 = vadd.f32 %v841_v39, %v771_v37  ;;  %v1128_v55 = vmax.f32 %v840_v46, 0.0 }
 0x14c   :  { %v1129_v50 = vmax.f32 %v842_v44, 0.0  ;;  %v1155_v1 = vmul.f32 %v1138_v56, %v1128_v55 }
 0x14e   :  { %v1156_v60 = vmul.f32 %v1142_v51, %v1129_v50 }
 0x150   :  { %v1159_v7 = vadd.f32 %v1156_v60, %v1155_v1 }
 0x187   :  { %v910_v35 = vpop.f32.mrf.mxu0 }
 0x188   :  { %v911_v45 = vadd.f32 %v910_v35, %v551_v38 }
 0x189   :  { %v981_v42 = vpop.f32.mrf.mxu1  ;;  %v912_v43 = vpop.f32.mrf.mxu0 }
 0x18a   :  { %v913_v47 = vadd.f32 %v912_v43, %v555_v41  ;;  %v982_v52 = vadd.f32 %v981_v42, %v911_v45 }
 0x18b   :  { %v983_v49 = vpop.f32.mrf.mxu1 }
 0x18c   :  { %v984_v57 = vadd.f32 %v983_v49, %v913_v47 }
 0x1c9   :  { %v1052_v53 = vpop.f32.mrf.mxu0 }
 0x1ca   :  { %v1123_v54 = vpop.f32.mrf.mxu1  ;;  %v1053_v58 = vadd.f32 %v1052_v53, %v982_v52 }
 0x1cb   :  { %v1054_v59 = vpop.f32.mrf.mxu0 }
 0x1cc   :  { %v1124_v61 = vadd.f32 %v1123_v54, %v1053_v58  ;;  %v1055_v63 = vadd.f32 %v1054_v59, %v984_v57  ;;  %v1125_v0 = vpop.f32.mrf.mxu1 }
 0x1ce   :  { %v1130_v2 = vmax.f32 %v1124_v61, 0.0  ;;  %v1126_v3 = vadd.f32 %v1125_v0, %v1055_v63 }
 0x1d0   :  { %v1157_v5 = vmul.f32 %v1146_v62, %v1130_v2  ;;  %v1131_v6 = vmax.f32 %v1126_v3, 0.0 }
 0x1d2   :  { %v1158_v8 = vmul.f32 %v1150_v4, %v1131_v6  ;;  %v1160_v9 = vadd.f32 %v1159_v7, %v1157_v5 }
 0x1d4   :  { %v1161_v10 = vadd.f32 %v1160_v9, %v1158_v8 }
 0x1d6   :  { %1162 = vadd.xlane.f32.xlu0 %v1161_v10 }
 0x25f   :  { %v1163_v12 = vpop.xlane.xlu0 %1162 }
 0x260   :  { %v1166_v13 = vadd.f32 %v1165_v11, %v1163_v12 }
 0x262   :  { %v1167_v14 = vsub.f32 0.0, %v1166_v13 }
 0x264   :  { %v1168_v15 = vmul.f32 1.442695, %v1167_v14 }
 0x266   :  { %1188 = vpow2.f32 %v1168_v15 }
 0x273   :  { %v1189_v18 = vpop.eup %1188 }
 0x274   :  { %v1170_v19 = vadd.f32 1.0, %v1189_v18 }
 0x276   :  { %1190 = vrcp.f32 %v1170_v19 }
 0x283   :  { %v1191_v22 = vpop.eup %1190 }
 0x284   :  { %v1179_v23 = vrot.slane %v1191_v22, %v1178_v21 }
 0x286   :  { %1182 = vst.msk [vmem:[%s2834_s4] sm:$0x1] %vm1181_vm0, %v1179_v23 }

</bundles_post_ra>
